<compile_context>
chip_gen: v7x
topology: tpu7x:2x2x1
jax: 0.10.0
libtpu: 0.0.40
codegen_flags: <defaults>
</compile_context>

<pallas_src>
import functools

import jax
import jax.numpy as jnp
import numpy as np
from jax.experimental import pallas as pl
from jax.experimental.pallas import tpu as pltpu


HIDDEN = 400
HIDDEN_PAD = 512                     # 4 x 128 lanes: dense vregs, clean MXU passes
OUT_SHAPE = (33, 7, 7)
OUT_DIM = int(np.prod(OUT_SHAPE))    # 1617
MAX_TB = 512                         # batch tile upper bound (multiple of 8)
_OUT_CHUNK = 512                     # N-chunk for the third matmul (multiple of 128)
_VMEM_LIMIT = 32 * 1024 * 1024       # ~14 MiB/step used; 32 MiB is safe on v5e/v6e/v7x


def _round_up(x, m):
    return (x + m - 1) // m * m


def _elu(x):
    # PyTorch ELU (alpha=1.0): x if x > 0 else exp(x) - 1.   exp() goes to the
    # EUP slot; the VPU only sees the subtract + select.  For large positive x
    # exp(x) overflows to +inf but that branch is never selected (no NaN).
    return jnp.where(x > 0, x, jnp.exp(x) - 1.0)


def _mlp_kernel(x_ref, w1_ref, b1_ref, w2_ref, b2_ref, w3_ref, b3_ref, o_ref):
    # bf16 operands on the MXU, f32 accumulation + f32 bias/ELU math.
    x = x_ref[...].astype(jnp.bfloat16)

    h1 = jnp.dot(x, w1_ref[...], preferred_element_type=jnp.float32) + b1_ref[...]
    h1 = _elu(h1).astype(jnp.bfloat16)

    h2 = jnp.dot(h1, w2_ref[...], preferred_element_type=jnp.float32) + b2_ref[...]
    h2 = _elu(h2).astype(jnp.bfloat16)

    # Third matmul in 128-multiple N chunks: bounds the live f32 accumulator to
    # tb x 512 (instead of tb x 1664) so Mosaic does not spill it through VMEM
    # before a separate bias/cast/store pass.
    n_out = o_ref.shape[-1]
    for start in range(0, n_out, _OUT_CHUNK):
        end = min(start + _OUT_CHUNK, n_out)
        acc = jnp.dot(h2, w3_ref[:, start:end],
                      preferred_element_type=jnp.float32)
        o_ref[:, start:end] = (acc + b3_ref[:, start:end]).astype(o_ref.dtype)


def prepare_params(params):
    """One-time parameter preparation (call once at init, NOT per forward).

    Zero-pads hidden 400 -> 512 and output 1617 -> 1664 (lane multiples of
    128) and casts weights to bf16 / biases to f32 row vectors.  The zero
    padding is a mathematical no-op (ELU(0) = 0 feeds zero weight rows).
    """
    w1, b1, w2, b2, w3, b3 = params
    out_dim = w3.shape[1]
    out_pad = _round_up(out_dim, 128)
    hpad = HIDDEN_PAD - HIDDEN
    opad = out_pad - out_dim

    w1p = jnp.pad(w1, ((0, 0), (0, hpad))).astype(jnp.bfloat16)
    b1p = jnp.pad(b1, (0, hpad)).astype(jnp.float32).reshape(1, -1)
    w2p = jnp.pad(w2, ((0, hpad), (0, hpad))).astype(jnp.bfloat16)
    b2p = jnp.pad(b2, (0, hpad)).astype(jnp.float32).reshape(1, -1)
    w3p = jnp.pad(w3, ((0, hpad), (0, opad))).astype(jnp.bfloat16)
    b3p = jnp.pad(b3, (0, opad)).astype(jnp.float32).reshape(1, -1)
    return (w1p, b1p, w2p, b2p, w3p, b3p)


def _pick_tb(batch):
    """Batch tile: multiple of 8, <= MAX_TB, and at least 2 grid steps once the
    batch is compute-relevant (B >= 256) so v7x's two TensorCores both work."""
    if batch <= 128:
        return _round_up(batch, 8)
    steps = max(-(-batch // MAX_TB), 2 if batch >= 256 else 1)
    return max(128, _round_up(-(-batch // steps), 8))


@functools.partial(jax.jit, static_argnames=("out_shape",))
def dense_decoder_forward(x, prepared_params, *, out_shape=OUT_SHAPE):
    """x: (B, in_dim) float32, prepared_params from prepare_params()
    -> (B, *out_shape) float32."""
    w1p, b1p, w2p, b2p, w3p, b3p = prepared_params
    B, in_dim = x.shape
    hidden_pad = w1p.shape[1]
    out_pad = w3p.shape[1]
    out_dim = int(np.prod(out_shape))

    # ---- batch tiling: pad ragged last tile, pipeline x/out over the grid ----
    tb = _pick_tb(B)
    b_pad = _round_up(B, tb)
    xp = jnp.pad(x, ((0, b_pad - B), (0, 0))) if b_pad != B else x
    grid = (b_pad // tb,)

    flops = 2 * b_pad * (in_dim * hidden_pad
                         + hidden_pad * hidden_pad
                         + hidden_pad * out_pad)
    bytes_accessed = (xp.size * 4
                      + (w1p.size + w2p.size + w3p.size) * 2
                      + (b1p.size + b2p.size + b3p.size) * 4
                      + b_pad * out_pad * 4)
    cost = pl.CostEstimate(flops=int(flops),
                           transcendentals=int(2 * b_pad * hidden_pad),
                           bytes_accessed=int(bytes_accessed))

    out_flat = pl.pallas_call(
        _mlp_kernel,
        out_shape=jax.ShapeDtypeStruct((b_pad, out_pad), jnp.float32),
        grid=grid,
        in_specs=[
            pl.BlockSpec((tb, in_dim), lambda i: (i, 0)),           # x: streamed
            pl.BlockSpec((in_dim, hidden_pad), lambda i: (0, 0)),   # weights stay
            pl.BlockSpec((1, hidden_pad), lambda i: (0, 0)),        # VMEM-resident
            pl.BlockSpec((hidden_pad, hidden_pad), lambda i: (0, 0)),
            pl.BlockSpec((1, hidden_pad), lambda i: (0, 0)),
            pl.BlockSpec((hidden_pad, out_pad), lambda i: (0, 0)),
            pl.BlockSpec((1, out_pad), lambda i: (0, 0)),
        ],
        out_specs=pl.BlockSpec((tb, out_pad), lambda i: (i, 0)),
        compiler_params=pltpu.CompilerParams(
            dimension_semantics=("parallel",),
            vmem_limit_bytes=_VMEM_LIMIT,
        ),
        cost_estimate=cost,
    )(xp, w1p, b1p, w2p, b2p, w3p, b3p)

    return out_flat[:B, :out_dim].reshape((B,) + tuple(out_shape))


def init_params(key, in_dim, hidden=HIDDEN, out_dim=OUT_DIM):
    """nn.Linear-style init (uniform +-1/sqrt(fan_in)); weights are (in, out)."""
    ks = jax.random.split(key, 6)

    def lin(kw, kb, fan_in, fan_out):
        bound = 1.0 / np.sqrt(fan_in)
        w = jax.random.uniform(kw, (fan_in, fan_out), jnp.float32, -bound, bound)
        b = jax.random.uniform(kb, (fan_out,), jnp.float32, -bound, bound)
        return w, b

    w1, b1 = lin(ks[0], ks[1], in_dim, hidden)
    w2, b2 = lin(ks[2], ks[3], hidden, hidden)
    w3, b3 = lin(ks[4], ks[5], hidden, out_dim)
    return (w1, b1, w2, b2, w3, b3)


def _reference_forward(x, params, out_shape=OUT_SHAPE):
    w1, b1, w2, b2, w3, b3 = params
    h1 = jax.nn.elu(x @ w1 + b1)
    h2 = jax.nn.elu(h1 @ w2 + b2)
    out = h2 @ w3 + b3
    return out.reshape((x.shape[0],) + tuple(out_shape))


if __name__ == "__main__":
    key = jax.random.PRNGKey(0)
    k_x, k_p, k_x2 = jax.random.split(key, 3)

    B, in_dim = 8, 32
    x = jax.random.normal(k_x, (B, in_dim), jnp.float32)
    params = init_params(k_p, in_dim)
    prepared = prepare_params(params)        # one-time pad + bf16 cast

    out = jax.block_until_ready(dense_decoder_forward(x, prepared))
    ref = _reference_forward(x, params)
    # bf16 MXU operands with f32 accumulation -> ~1e-2-level relative error.
    np.testing.assert_allclose(np.asarray(out), np.asarray(ref),
                               rtol=5e-2, atol=5e-2)
    assert out.shape == (B,) + OUT_SHAPE

    # Exercise the multi-step grid / ragged-batch path (2 grid steps + pad).
    B2 = 300
    x2 = jax.random.normal(k_x2, (B2, in_dim), jnp.float32)
    out2 = jax.block_until_ready(dense_decoder_forward(x2, prepared))
    ref2 = _reference_forward(x2, params)
    np.testing.assert_allclose(np.asarray(out2), np.asarray(ref2),
                               rtol=5e-2, atol=5e-2)
    assert out2.shape == (B2,) + OUT_SHAPE

    print("KERNEL_OK")
</pallas_src>

<mosaic_0001>
module attributes {stable_mosaic.version = 11 : i64} {
  func.func @_mlp_kernel(%arg0: i32, %arg1: memref<8x32xf32, #tpu.memory_space<vmem>>, %arg2: memref<32x512xbf16, #tpu.memory_space<vmem>>, %arg3: memref<1x512xf32, #tpu.memory_space<vmem>>, %arg4: memref<512x512xbf16, #tpu.memory_space<vmem>>, %arg5: memref<1x512xf32, #tpu.memory_space<vmem>>, %arg6: memref<512x1664xbf16, #tpu.memory_space<vmem>>, %arg7: memref<1x1664xf32, #tpu.memory_space<vmem>>, %arg8: memref<8x1664xf32, #tpu.memory_space<vmem>>) attributes {dimension_semantics = [#tpu.dimension_semantics<parallel>], iteration_bounds = array<i64: 1>, scalar_prefetch = 0 : i64, scratch_operands = 0 : i64, tpu.core_type = #tpu.core_type<tc>, window_params = [{transform_indices = @transform_0, window_bounds = array<i64: 8, 32>}, {pipeline_mode = #tpu.pipeline_mode<synchronous>, transform_indices = @transform_1, window_bounds = array<i64: 32, 512>}, {pipeline_mode = #tpu.pipeline_mode<synchronous>, transform_indices = @transform_2, window_bounds = array<i64: 1, 512>}, {pipeline_mode = #tpu.pipeline_mode<synchronous>, transform_indices = @transform_3, window_bounds = array<i64: 512, 512>}, {pipeline_mode = #tpu.pipeline_mode<synchronous>, transform_indices = @transform_4, window_bounds = array<i64: 1, 512>}, {pipeline_mode = #tpu.pipeline_mode<synchronous>, transform_indices = @transform_5, window_bounds = array<i64: 512, 1664>}, {pipeline_mode = #tpu.pipeline_mode<synchronous>, transform_indices = @transform_6, window_bounds = array<i64: 1, 1664>}, {transform_indices = @transform_7, window_bounds = array<i64: 8, 1664>}]} {
    %c0 = arith.constant 0 : index
    %c0_0 = arith.constant 0 : index
    %0 = vector.load %arg1[%c0, %c0_0] : memref<8x32xf32, #tpu.memory_space<vmem>>, vector<8x32xf32>
    %1 = arith.truncf %0 : vector<8x32xf32> to vector<8x32xbf16>
    %c0_1 = arith.constant 0 : index
    %c0_2 = arith.constant 0 : index
    %2 = vector.load %arg2[%c0_1, %c0_2] : memref<32x512xbf16, #tpu.memory_space<vmem>>, vector<32x512xbf16>
    %cst = arith.constant dense<0.000000e+00> : vector<8x512xf32>
    %3 = tpu.matmul %1, %2, %cst {dimension_numbers = #tpu.dot_dimension_numbers<[1], [0], [0], [1], [0, 0, 1, 1], [], []>} : vector<8x32xbf16>, vector<32x512xbf16>, vector<8x512xf32> -> vector<8x512xf32>
    %c0_3 = arith.constant 0 : index
    %c0_4 = arith.constant 0 : index
    %4 = vector.load %arg3[%c0_3, %c0_4] : memref<1x512xf32, #tpu.memory_space<vmem>>, vector<1x512xf32>
    %5 = vector.broadcast %4 : vector<1x512xf32> to vector<8x512xf32>
    %6 = arith.addf %3, %5 : vector<8x512xf32>
    %cst_5 = arith.constant 0.000000e+00 : f32
    %7 = vector.broadcast %cst_5 : f32 to vector<8x512xf32>
    %8 = arith.cmpf ogt, %6, %7 : vector<8x512xf32>
    %9 = math.exp %6 : vector<8x512xf32>
    %cst_6 = arith.constant 1.000000e+00 : f32
    %10 = vector.broadcast %cst_6 : f32 to vector<8x512xf32>
    %11 = arith.subf %9, %10 : vector<8x512xf32>
    %12 = arith.select %8, %6, %11 : vector<8x512xi1>, vector<8x512xf32>
    %13 = arith.truncf %12 : vector<8x512xf32> to vector<8x512xbf16>
    %c0_7 = arith.constant 0 : index
    %c0_8 = arith.constant 0 : index
    %14 = vector.load %arg4[%c0_7, %c0_8] : memref<512x512xbf16, #tpu.memory_space<vmem>>, vector<512x512xbf16>
    %cst_9 = arith.constant dense<0.000000e+00> : vector<8x512xf32>
    %15 = tpu.matmul %13, %14, %cst_9 {dimension_numbers = #tpu.dot_dimension_numbers<[1], [0], [0], [1], [0, 0, 1, 1], [], []>} : vector<8x512xbf16>, vector<512x512xbf16>, vector<8x512xf32> -> vector<8x512xf32>
    %c0_10 = arith.constant 0 : index
    %c0_11 = arith.constant 0 : index
    %16 = vector.load %arg5[%c0_10, %c0_11] : memref<1x512xf32, #tpu.memory_space<vmem>>, vector<1x512xf32>
    %17 = vector.broadcast %16 : vector<1x512xf32> to vector<8x512xf32>
    %18 = arith.addf %15, %17 : vector<8x512xf32>
    %cst_12 = arith.constant 0.000000e+00 : f32
    %19 = vector.broadcast %cst_12 : f32 to vector<8x512xf32>
    %20 = arith.cmpf ogt, %18, %19 : vector<8x512xf32>
    %21 = math.exp %18 : vector<8x512xf32>
    %cst_13 = arith.constant 1.000000e+00 : f32
    %22 = vector.broadcast %cst_13 : f32 to vector<8x512xf32>
    %23 = arith.subf %21, %22 : vector<8x512xf32>
    %24 = arith.select %20, %18, %23 : vector<8x512xi1>, vector<8x512xf32>
    %25 = arith.truncf %24 : vector<8x512xf32> to vector<8x512xbf16>
    %c0_14 = arith.constant 0 : index
    %c0_15 = arith.constant 0 : index
    %26 = vector.load %arg6[%c0_14, %c0_15] : memref<512x1664xbf16, #tpu.memory_space<vmem>>, vector<512x512xbf16>
    %cst_16 = arith.constant dense<0.000000e+00> : vector<8x512xf32>
    %27 = tpu.matmul %25, %26, %cst_16 {dimension_numbers = #tpu.dot_dimension_numbers<[1], [0], [0], [1], [0, 0, 1, 1], [], []>} : vector<8x512xbf16>, vector<512x512xbf16>, vector<8x512xf32> -> vector<8x512xf32>
    %c0_17 = arith.constant 0 : index
    %c0_18 = arith.constant 0 : index
    %28 = vector.load %arg7[%c0_17, %c0_18] : memref<1x1664xf32, #tpu.memory_space<vmem>>, vector<1x512xf32>
    %29 = vector.broadcast %28 : vector<1x512xf32> to vector<8x512xf32>
    %30 = arith.addf %27, %29 : vector<8x512xf32>
    %c0_19 = arith.constant 0 : index
    %c0_20 = arith.constant 0 : index
    %31 = vector.load %arg8[%c0_19, %c0_20] : memref<8x1664xf32, #tpu.memory_space<vmem>>, vector<8x512xf32>
    tpu.vector_store %arg8[%c0_19, %c0_20], %30 {strides = array<i32>} : memref<8x1664xf32, #tpu.memory_space<vmem>>, vector<8x512xf32>,
    %c0_21 = arith.constant 0 : index
    %c512 = arith.constant 512 : index
    %32 = vector.load %arg6[%c0_21, %c512] : memref<512x1664xbf16, #tpu.memory_space<vmem>>, vector<512x512xbf16>
    %cst_22 = arith.constant dense<0.000000e+00> : vector<8x512xf32>
    %33 = tpu.matmul %25, %32, %cst_22 {dimension_numbers = #tpu.dot_dimension_numbers<[1], [0], [0], [1], [0, 0, 1, 1], [], []>} : vector<8x512xbf16>, vector<512x512xbf16>, vector<8x512xf32> -> vector<8x512xf32>
    %c0_23 = arith.constant 0 : index
    %c512_24 = arith.constant 512 : index
    %34 = vector.load %arg7[%c0_23, %c512_24] : memref<1x1664xf32, #tpu.memory_space<vmem>>, vector<1x512xf32>
    %35 = vector.broadcast %34 : vector<1x512xf32> to vector<8x512xf32>
    %36 = arith.addf %33, %35 : vector<8x512xf32>
    %c0_25 = arith.constant 0 : index
    %c512_26 = arith.constant 512 : index
    %37 = vector.load %arg8[%c0_25, %c512_26] : memref<8x1664xf32, #tpu.memory_space<vmem>>, vector<8x512xf32>
    tpu.vector_store %arg8[%c0_25, %c512_26], %36 {strides = array<i32>} : memref<8x1664xf32, #tpu.memory_space<vmem>>, vector<8x512xf32>,
    %c0_27 = arith.constant 0 : index
    %c1024 = arith.constant 1024 : index
    %38 = vector.load %arg6[%c0_27, %c1024] : memref<512x1664xbf16, #tpu.memory_space<vmem>>, vector<512x512xbf16>
    %cst_28 = arith.constant dense<0.000000e+00> : vector<8x512xf32>
    %39 = tpu.matmul %25, %38, %cst_28 {dimension_numbers = #tpu.dot_dimension_numbers<[1], [0], [0], [1], [0, 0, 1, 1], [], []>} : vector<8x512xbf16>, vector<512x512xbf16>, vector<8x512xf32> -> vector<8x512xf32>
    %c0_29 = arith.constant 0 : index
    %c1024_30 = arith.constant 1024 : index
    %40 = vector.load %arg7[%c0_29, %c1024_30] : memref<1x1664xf32, #tpu.memory_space<vmem>>, vector<1x512xf32>
    %41 = vector.broadcast %40 : vector<1x512xf32> to vector<8x512xf32>
    %42 = arith.addf %39, %41 : vector<8x512xf32>
    %c0_31 = arith.constant 0 : index
    %c1024_32 = arith.constant 1024 : index
    %43 = vector.load %arg8[%c0_31, %c1024_32] : memref<8x1664xf32, #tpu.memory_space<vmem>>, vector<8x512xf32>
    tpu.vector_store %arg8[%c0_31, %c1024_32], %42 {strides = array<i32>} : memref<8x1664xf32, #tpu.memory_space<vmem>>, vector<8x512xf32>,
    %c0_33 = arith.constant 0 : index
    %c1536 = arith.constant 1536 : index
    %44 = vector.load %arg6[%c0_33, %c1536] : memref<512x1664xbf16, #tpu.memory_space<vmem>>, vector<512x128xbf16>
    %cst_34 = arith.constant dense<0.000000e+00> : vector<8x128xf32>
    %45 = tpu.matmul %25, %44, %cst_34 {dimension_numbers = #tpu.dot_dimension_numbers<[1], [0], [0], [1], [0, 0, 1, 1], [], []>} : vector<8x512xbf16>, vector<512x128xbf16>, vector<8x128xf32> -> vector<8x128xf32>
    %c0_35 = arith.constant 0 : index
    %c1536_36 = arith.constant 1536 : index
    %46 = vector.load %arg7[%c0_35, %c1536_36] : memref<1x1664xf32, #tpu.memory_space<vmem>>, vector<1x128xf32>
    %47 = vector.broadcast %46 : vector<1x128xf32> to vector<8x128xf32>
    %48 = arith.addf %45, %47 : vector<8x128xf32>
    %c0_37 = arith.constant 0 : index
    %c1536_38 = arith.constant 1536 : index
    %49 = vector.load %arg8[%c0_37, %c1536_38] : memref<8x1664xf32, #tpu.memory_space<vmem>>, vector<8x128xf32>
    tpu.vector_store %arg8[%c0_37, %c1536_38], %48 {strides = array<i32>} : memref<8x1664xf32, #tpu.memory_space<vmem>>, vector<8x128xf32>,
    return
  }
  func.func @transform_0(%arg0: i32) -> (i32, i32) {
    %c0_i32 = arith.constant 0 : i32
    %c0_i32_0 = arith.constant 0 : i32
    return %arg0, %c0_i32 : i32, i32
  }
  func.func @transform_1(%arg0: i32) -> (i32, i32) {
    %c0_i32 = arith.constant 0 : i32
    %c0_i32_0 = arith.constant 0 : i32
    %c0_i32_1 = arith.constant 0 : i32
    return %c0_i32, %c0_i32_0 : i32, i32
  }
  func.func @transform_2(%arg0: i32) -> (i32, i32) {
    %c0_i32 = arith.constant 0 : i32
    %c0_i32_0 = arith.constant 0 : i32
    %c0_i32_1 = arith.constant 0 : i32
    return %c0_i32, %c0_i32_0 : i32, i32
  }
  func.func @transform_3(%arg0: i32) -> (i32, i32) {
    %c0_i32 = arith.constant 0 : i32
    %c0_i32_0 = arith.constant 0 : i32
    %c0_i32_1 = arith.constant 0 : i32
    return %c0_i32, %c0_i32_0 : i32, i32
  }
  func.func @transform_4(%arg0: i32) -> (i32, i32) {
    %c0_i32 = arith.constant 0 : i32
    %c0_i32_0 = arith.constant 0 : i32
    %c0_i32_1 = arith.constant 0 : i32
    return %c0_i32, %c0_i32_0 : i32, i32
  }
  func.func @transform_5(%arg0: i32) -> (i32, i32) {
    %c0_i32 = arith.constant 0 : i32
    %c0_i32_0 = arith.constant 0 : i32
    %c0_i32_1 = arith.constant 0 : i32
    return %c0_i32, %c0_i32_0 : i32, i32
  }
  func.func @transform_6(%arg0: i32) -> (i32, i32) {
    %c0_i32 = arith.constant 0 : i32
    %c0_i32_0 = arith.constant 0 : i32
    %c0_i32_1 = arith.constant 0 : i32
    return %c0_i32, %c0_i32_0 : i32, i32
  }
  func.func @transform_7(%arg0: i32) -> (i32, i32) {
    %c0_i32 = arith.constant 0 : i32
    %c0_i32_0 = arith.constant 0 : i32
    return %arg0, %c0_i32 : i32, i32
  }
}

</mosaic_0001>

<bundles_post_ra>
// kernel: dense_decoder_forward.1
= control target key start
LH: loop header
LB: loop body
LE: loop exit
PB: predicated region body
PF: predicated region fallthrough
CT: control target
= control target key end

     0   :  { %12 = vsyncpa [#allocation3], 0  ;;  %s6420_s0 = inlined_call_operand.hbm [shape: f32[8,32], index: 0, kind: input, shape index: {}]   ;;  %s6421_s1 = inlined_call_operand.hbm [shape: bf16[32,512], index: 1, kind: input, shape index: {}]   ;;  %s6422_s2 = inlined_call_operand.hbm [shape: f32[1,512], index: 2, kind: input, shape index: {}]   ;;  %s6423_s3 = inlined_call_operand.hbm [shape: bf16[512,512], index: 3, kind: input, shape index: {}]   ;;  %s6424_s4 = inlined_call_operand.hbm [shape: f32[1,512], index: 4, kind: input, shape index: {}]   ;;  %s6425_s5 = inlined_call_operand.hbm [shape: bf16[512,1664], index: 5, kind: input, shape index: {}]   ;;  %s6426_s6 = inlined_call_operand.hbm [shape: f32[1,1664], index: 6, kind: input, shape index: {}]   ;;  %s6427_s7 = inlined_call_operand.vmem [shape: f32[8,1664], index: 7, kind: output, shape index: {}]  }
   0x1   :  { %13 = vsyncpa [#allocation5], 0 }
   0x2   :  { %14 = vsyncpa [#allocation8], 0 }
   0x3   :  { %15 = vsyncpa [#allocation11], 0  ;;  %s6157_s24 = smov [#allocation4]   ;;  %s5995_s28 = scalar_lea.hbm %s6421_s1, 1024 }
   0x4   :  { %s31_s25 = sshll.u32 %s6157_s24, 4  ;;  %p5996_p0 = scmp.ne.s32.totalorder %s6421_s1, %s5995_s28  ;;  %s32_s25 = int_to_ptr.vmem [resolvable:$true] %s31_s25 }
   0x5   :  { %p5999_p1 = scmp.lt.u32.totalorder %s5995_s28, %s6421_s1 }
   0x7   :  { %p6001_p2 = pnand %p5999_p1, %p5996_p0 }
   0x9   :  { %6004 = shalt.err (!%p6001_p2)
}
   0xa   :  { %s6005_s10 = scalar_lea.vmem %s32_s25, 1024  ;;  %p6010_p4 = scmp.lt.s32.totalorder %s32_s25, %s32_s25 }
   0xb   :  { %p6006_p3 = scmp.ne.s32.totalorder %s32_s25, %s6005_s10  ;;  %p6011_p5 = scmp.lt.s32.totalorder %s6005_s10, %s6005_s10 }
   0xd   :  { %p6012_p6 = por %p6011_p5, %p6010_p4 }
   0xf   :  { %p6013_p7 = pnand %p6012_p6, %p6006_p3 }
  0x11   :  { %6016 = shalt.err (!%p6013_p7)
}
  0x12   :  { %s6158_s11 = smov 256   ;;  %s6159_s12 = smov 16  }
  0x13   :  { %37 = dma.hbm_to_vmem [thread:$0]  %s6421_s1, 1024, %s32_s25, [#allocation5], %s6158_s11, %s6158_s11, %s6159_s12  }
  0x14   :  { %s6160_s15 = smov [#allocation7]   ;;  %s6161_s17 = smov [#allocation10]  }
  0x15   :  { %s53_s16 = sshll.u32 %s6160_s15, 4  ;;  %s75_s18 = sshll.u32 %s6161_s17, 4  ;;  %s54_s16 = int_to_ptr.vmem [resolvable:$true] %s53_s16  ;;  %s76_s18 = int_to_ptr.vmem [resolvable:$true] %s75_s18 }
  0x16   :  { %s6017_s21 = scalar_lea.hbm %s6423_s3, 16384 }
  0x17   :  { %p6018_p8 = scmp.ne.s32.totalorder %s6423_s3, %s6017_s21  ;;  %p6021_p9 = scmp.lt.u32.totalorder %s6017_s21, %s6423_s3 }
  0x19   :  { %p6023_p10 = pnand %p6021_p9, %p6018_p8 }
  0x1b   :  { %6026 = shalt.err (!%p6023_p10)
}
  0x1c   :  { %s6027_s1 = scalar_lea.vmem %s54_s16, 16384  ;;  %p6032_p12 = scmp.lt.s32.totalorder %s54_s16, %s54_s16 }
  0x1d   :  { %p6028_p11 = scmp.ne.s32.totalorder %s54_s16, %s6027_s1  ;;  %p6033_p13 = scmp.lt.s32.totalorder %s6027_s1, %s6027_s1 }
  0x1f   :  { %p6034_p0 = por %p6033_p13, %p6032_p12 }
  0x21   :  { %p6035_p1 = pnand %p6034_p0, %p6028_p11 }
  0x23   :  { %6038 = shalt.err (!%p6035_p1)
}
  0x24   :  { %59 = dma.hbm_to_vmem [thread:$0]  %s6423_s3, 16384, %s54_s16, [#allocation8], %s6158_s11, %s6158_s11, %s6159_s12  }
  0x25   :  { %s6039_s30 = scalar_lea.hbm %s6425_s5, 53248 }
  0x26   :  { %p6040_p2 = scmp.ne.s32.totalorder %s6425_s5, %s6039_s30  ;;  %p6043_p3 = scmp.lt.u32.totalorder %s6039_s30, %s6425_s5 }
  0x28   :  { %p6045_p4 = pnand %p6043_p3, %p6040_p2 }
  0x2a   :  { %6048 = shalt.err (!%p6045_p4)
}
  0x2b   :  { %s6049_s14 = scalar_lea.vmem %s76_s18, 53248  ;;  %p6054_p6 = scmp.lt.s32.totalorder %s76_s18, %s76_s18 }
  0x2c   :  { %p6050_p5 = scmp.ne.s32.totalorder %s76_s18, %s6049_s14  ;;  %p6055_p7 = scmp.lt.s32.totalorder %s6049_s14, %s6049_s14 }
  0x2e   :  { %p6056_p8 = por %p6055_p7, %p6054_p6 }
  0x30   :  { %p6057_p9 = pnand %p6056_p8, %p6050_p5 }
  0x32   :  { %6060 = shalt.err (!%p6057_p9)
}
  0x33   :  { %s6162_s3 = smov 832   ;;  %s6163_s11 = smov 52  }
  0x34   :  { %81 = dma.hbm_to_vmem [thread:$0]  %s6425_s5, 53248, %s76_s18, [#allocation11], %s6162_s3, %s6162_s3, %s6163_s11  }
  0x35   :  { %s6164_s16 = smov [#allocation2]   ;;  %s6165_s19 = smov [#allocation6]  }
  0x36   :  { %s22_s17 = sshll.u32 %s6164_s16, 4  ;;  %s44_s20 = sshll.u32 %s6165_s19, 4  ;;  %s23_s17 = int_to_ptr.vmem [resolvable:$true] %s22_s17  ;;  %s45_s20 = int_to_ptr.vmem [resolvable:$true] %s44_s20 }
  0x37   :  { %s6061_s23 = scalar_lea.hbm %s6420_s0, 128 }
  0x38   :  { %p6062_p10 = scmp.ne.s32.totalorder %s6420_s0, %s6061_s23  ;;  %p6065_p11 = scmp.lt.u32.totalorder %s6061_s23, %s6420_s0 }
  0x3a   :  { %p6067_p12 = pnand %p6065_p11, %p6062_p10 }
  0x3c   :  { %6070 = shalt.err (!%p6067_p12)
}
  0x3d   :  { %s6071_s5 = scalar_lea.vmem %s23_s17, 128  ;;  %p6076_p0 = scmp.lt.s32.totalorder %s23_s17, %s23_s17 }
  0x3e   :  { %p6072_p13 = scmp.ne.s32.totalorder %s23_s17, %s6071_s5  ;;  %p6077_p1 = scmp.lt.s32.totalorder %s6071_s5, %s6071_s5 }
  0x40   :  { %p6078_p2 = por %p6077_p1, %p6076_p0 }
  0x42   :  { %p6079_p3 = pnand %p6078_p2, %p6072_p13 }
  0x44   :  { %6082 = shalt.err (!%p6079_p3)
}
  0x45   :  { %25 = dma.hbm_to_vmem [thread:$0]  %s6420_s0, 128, %s23_s17, [#allocation3]  }
  0x46   :  { %s6083_s30 = scalar_lea.hbm %s6422_s2, 64 }
  0x47   :  { %p6084_p4 = scmp.ne.s32.totalorder %s6422_s2, %s6083_s30  ;;  %p6087_p5 = scmp.lt.u32.totalorder %s6083_s30, %s6422_s2 }
  0x49   :  { %p6089_p6 = pnand %p6087_p5, %p6084_p4 }
  0x4b   :  { %6092 = shalt.err (!%p6089_p6)
}
  0x4c   :  { %s6093_s14 = scalar_lea.vmem %s45_s20, 64  ;;  %p6098_p8 = scmp.lt.s32.totalorder %s45_s20, %s45_s20 }
  0x4d   :  { %p6094_p7 = scmp.ne.s32.totalorder %s45_s20, %s6093_s14  ;;  %p6099_p9 = scmp.lt.s32.totalorder %s6093_s14, %s6093_s14 }
  0x4f   :  { %p6100_p10 = por %p6099_p9, %p6098_p8 }
  0x51   :  { %p6101_p11 = pnand %p6100_p10, %p6094_p7 }
  0x53   :  { %6104 = shalt.err (!%p6101_p11)
}
  0x54   :  { %47 = dma.hbm_to_vmem [thread:$0]  %s6422_s2, 64, %s45_s20, [#allocation5]  }
  0x55   :  { %s6166_s11 = smov [#allocation9]   ;;  %s6167_s15 = smov [#allocation12]  }
  0x56   :  { %s66_s12 = sshll.u32 %s6166_s11, 4  ;;  %s88_s16 = sshll.u32 %s6167_s15, 4  ;;  %s67_s12 = int_to_ptr.vmem [resolvable:$true] %s66_s12  ;;  %s89_s16 = int_to_ptr.vmem [resolvable:$true] %s88_s16 }
  0x57   :  { %s6105_s21 = scalar_lea.hbm %s6424_s4, 64 }
  0x58   :  { %p6106_p12 = scmp.ne.s32.totalorder %s6424_s4, %s6105_s21  ;;  %p6109_p13 = scmp.lt.u32.totalorder %s6105_s21, %s6424_s4 }
  0x5a   :  { %p6111_p0 = pnand %p6109_p13, %p6106_p12 }
  0x5c   :  { %6114 = shalt.err (!%p6111_p0)
}
  0x5d   :  { %s6115_s2 = scalar_lea.vmem %s67_s12, 64  ;;  %p6120_p2 = scmp.lt.s32.totalorder %s67_s12, %s67_s12 }
  0x5e   :  { %p6116_p1 = scmp.ne.s32.totalorder %s67_s12, %s6115_s2  ;;  %p6121_p3 = scmp.lt.s32.totalorder %s6115_s2, %s6115_s2 }
  0x60   :  { %p6122_p4 = por %p6121_p3, %p6120_p2 }
  0x62   :  { %p6123_p5 = pnand %p6122_p4, %p6116_p1 }
  0x64   :  { %6126 = shalt.err (!%p6123_p5)
}
  0x65   :  { %69 = dma.hbm_to_vmem [thread:$0]  %s6424_s4, 64, %s67_s12, [#allocation8]  }
  0x66   :  { %s6127_s18 = scalar_lea.hbm %s6426_s6, 208 }
  0x67   :  { %p6128_p6 = scmp.ne.s32.totalorder %s6426_s6, %s6127_s18  ;;  %p6131_p7 = scmp.lt.u32.totalorder %s6127_s18, %s6426_s6 }
  0x69   :  { %p6133_p8 = pnand %p6131_p7, %p6128_p6 }
  0x6b   :  { %6136 = shalt.err (!%p6133_p8)
}
  0x6c   :  { %s6137_s8 = scalar_lea.vmem %s89_s16, 208  ;;  %s6141_s9 = scalar_lea.vmem %s89_s16, 224 }
  0x6d   :  { %p6138_p9 = scmp.ne.s32.totalorder %s89_s16, %s6137_s8  ;;  %p6142_p10 = scmp.lt.s32.totalorder %s89_s16, %s89_s16 }
  0x6e   :  { %p6143_p11 = scmp.lt.s32.totalorder %s6141_s9, %s6137_s8 }
  0x70   :  { %p6144_p12 = por %p6143_p11, %p6142_p10 }
  0x72   :  { %p6145_p13 = pnand %p6144_p12, %p6138_p9 }
  0x74   :  { %6148 = shalt.err (!%p6145_p13)
}
  0x75   :  { %91 = dma.hbm_to_vmem [thread:$0]  %s6426_s6, 208, %s89_s16, [#allocation11]  }
  0x76   :  { %6149 = dma.done.wait [#allocation3], 128  }
  0x77   :  { %6150 = vsyncadd [#allocation3], 4294967168 }
  0x78   :  { %6151 = dma.done.wait [#allocation5], 1088  }
  0x79   :  { %6152 = vsyncadd [#allocation5], 4294966208 }
  0x7a   :  { %6153 = dma.done.wait [#allocation8], 16448  }
  0x7b   :  { %6154 = vsyncadd [#allocation8], 4294950848 }
  0x7c   :  { %6155 = dma.done.wait [#allocation11], 53456  }
  0x7d   :  { %6156 = vsyncadd [#allocation11], 4294913840  ;;  %v6168_v0 = vmov 0   ;;  %v5167_v1 = vld [vmem:[#allocation4 + $0x4] ss:$16 sps:$4 sm:$0xff]   ;;  %v114_v5 = vld [vmem:[#allocation2] sm:$0xff] }
  0x7e   :  { %222 = vmatprep.mubr.bf16.mxu0 %v6168_v0  ;;  %263 = vmatprep.mubr.bf16.mxu1 %v6168_v0  ;;  %v5169_v2 = vld [vmem:[#allocation4] ss:$16 sps:$4 sm:$0xff]   ;;  %v5170_v3 = vld [vmem:[#allocation4 + $0x24] ss:$16 sps:$4 sm:$0xff]   ;;  %v5173_v6 = vld [vmem:[#allocation4 + $0xc] ss:$16 sps:$4 sm:$0xff]   ;;  %v115_v9 = vpack.c.bf16 %v114_v5, %v114_v5 }
  0x7f   :  { %190 = vmatprep.subr.bf16.mxu0 %v5167_v1  ;;  %v5172_v4 = vld [vmem:[#allocation4 + $0x20] ss:$16 sps:$4 sm:$0xff]   ;;  %v5175_v7 = vld [vmem:[#allocation4 + $0x8] ss:$16 sps:$4 sm:$0xff]   ;;  %231 = vmatprep.subr.bf16.mxu1 %v5173_v6  ;;  %v5176_v8 = vld [vmem:[#allocation4 + $0x2c] ss:$16 sps:$4 sm:$0xff]  }
  0x80   :  { %191 = vmatpush1.bf16.msra.mxu0 %v5169_v2  ;;  %232 = vmatpush1.bf16.msra.mxu1 %v5175_v7  ;;  %v5178_v10 = vld [vmem:[#allocation4 + $0x28] ss:$16 sps:$4 sm:$0xff]   ;;  %vm186_vm0 = vcmask 261120   ;;  %v5179_v12 = vld [vmem:[#allocation7] ss:$16 sps:$4 sm:$0xff]  }
  0x81   :  { %192 = vmatprep.subr.bf16.mxu0 %v5170_v3  ;;  %v5181_v11 = vld [vmem:[#allocation7 + $0x4] ss:$16 sps:$4 sm:$0xff]   ;;  %233 = vmatprep.subr.bf16.mxu1 %v5176_v8  ;;  %v5184_v13 = vld [vmem:[#allocation7 + $0xc] ss:$16 sps:$4 sm:$0xff]   ;;  %v5182_v15 = vld [vmem:[#allocation7 + $0x8] ss:$16 sps:$4 sm:$0xff]  }
  0x82   :  { %v5187_v14 = vld [vmem:[#allocation7 + $0x24] ss:$16 sps:$4 sm:$0xff]   ;;  %v5185_v16 = vld [vmem:[#allocation7 + $0x20] ss:$16 sps:$4 sm:$0xff]   ;;  %v5190_v17 = vld [vmem:[#allocation7 + $0x2c] ss:$16 sps:$4 sm:$0xff]  }
  0x83   :  { %v5193_v18 = vld [vmem:[#allocation7 + $0x44] ss:$16 sps:$4 sm:$0xff]   ;;  %v5188_v19 = vld [vmem:[#allocation7 + $0x28] ss:$16 sps:$4 sm:$0xff]   ;;  %v5191_v20 = vld [vmem:[#allocation7 + $0x40] ss:$16 sps:$4 sm:$0xff]  }
  0x84   :  { %193 = vmatpush1.bf16.msra.mxu0 %v5172_v4  ;;  %234 = vmatpush1.bf16.msra.mxu1 %v5178_v10  ;;  %v5196_v21 = vld [vmem:[#allocation7 + $0x4c] ss:$16 sps:$4 sm:$0xff]   ;;  %v5199_v22 = vld [vmem:[#allocation7 + $0x64] ss:$16 sps:$4 sm:$0xff]   ;;  %v5194_v23 = vld [vmem:[#allocation7 + $0x48] ss:$16 sps:$4 sm:$0xff]  }
  0x85   :  { %1086 = vmatprep.subr.bf16.mxu0 %v5181_v11  ;;  %1168 = vmatprep.subr.bf16.mxu1 %v5184_v13  ;;  %v5197_v24 = vld [vmem:[#allocation7 + $0x60] ss:$16 sps:$4 sm:$0xff]   ;;  %v5202_v25 = vld [vmem:[#allocation7 + $0x6c] ss:$16 sps:$4 sm:$0xff]   ;;  %v5205_v26 = vld [vmem:[#allocation7 + $0x84] ss:$16 sps:$4 sm:$0xff]   ;;  %v126_v13 = vlaneseq }
  0x86   :  { %v5200_v27 = vld [vmem:[#allocation7 + $0x68] ss:$16 sps:$4 sm:$0xff]   ;;  %v5203_v28 = vld [vmem:[#allocation7 + $0x80] ss:$16 sps:$4 sm:$0xff]   ;;  %v5208_v29 = vld [vmem:[#allocation7 + $0x8c] ss:$16 sps:$4 sm:$0xff]  }
  0x87   :  { %4508 = vmatmul.mubr.msk.bf16.vlgmr.msra.gmra.mrb[0].mxu0 %vm186_vm0, %v115_v9  ;;  %4509 = vmatmul.mubr.msk.bf16.vlgmr.msra.gmra.mrb[0].mxu1 %vm186_vm0, %v115_v9  ;;  %v5211_v30 = vld [vmem:[#allocation7 + $0xa4] ss:$16 sps:$4 sm:$0xff]   ;;  %v5206_v31 = vld [vmem:[#allocation7 + $0x88] ss:$16 sps:$4 sm:$0xff]   ;;  %v5209_v32 = vld [vmem:[#allocation7 + $0xa0] ss:$16 sps:$4 sm:$0xff]  }
  0x88   :  { %1087 = vmatpush1.bf16.msra.mxu0 %v5179_v12  ;;  %1169 = vmatpush1.bf16.msra.mxu1 %v5182_v15  ;;  %v5214_v33 = vld [vmem:[#allocation7 + $0xac] ss:$16 sps:$4 sm:$0xff]   ;;  %v5217_v34 = vld [vmem:[#allocation7 + $0xc4] ss:$16 sps:$4 sm:$0xff]   ;;  %v5212_v35 = vld [vmem:[#allocation7 + $0xa8] ss:$16 sps:$4 sm:$0xff]  }
  0x89   :  { %1088 = vmatprep.subr.bf16.mxu0 %v5187_v14  ;;  %1170 = vmatprep.subr.bf16.mxu1 %v5190_v17  ;;  %v5215_v36 = vld [vmem:[#allocation7 + $0xc0] ss:$16 sps:$4 sm:$0xff]   ;;  %v5220_v37 = vld [vmem:[#allocation7 + $0xcc] ss:$16 sps:$4 sm:$0xff]   ;;  %v5223_v38 = vld [vmem:[#allocation7 + $0xe4] ss:$16 sps:$4 sm:$0xff]  }
  0x8a   :  { %v5218_v39 = vld [vmem:[#allocation7 + $0xc8] ss:$16 sps:$4 sm:$0xff]   ;;  %v5221_v40 = vld [vmem:[#allocation7 + $0xe0] ss:$16 sps:$4 sm:$0xff]   ;;  %v5226_v41 = vld [vmem:[#allocation7 + $0xec] ss:$16 sps:$4 sm:$0xff]  }
  0x8b   :  { %v5229_v42 = vld [vmem:[#allocation7 + $0x104] ss:$16 sps:$4 sm:$0xff]   ;;  %v5224_v43 = vld [vmem:[#allocation7 + $0xe8] ss:$16 sps:$4 sm:$0xff]   ;;  %v5227_v44 = vld [vmem:[#allocation7 + $0x100] ss:$16 sps:$4 sm:$0xff]  }
  0x8c   :  { %1089 = vmatpush1.bf16.msra.mxu0 %v5185_v16  ;;  %1171 = vmatpush1.bf16.msra.mxu1 %v5188_v19  ;;  %v5232_v45 = vld [vmem:[#allocation7 + $0x10c] ss:$16 sps:$4 sm:$0xff]   ;;  %v5235_v46 = vld [vmem:[#allocation7 + $0x124] ss:$16 sps:$4 sm:$0xff]   ;;  %v5230_v47 = vld [vmem:[#allocation7 + $0x108] ss:$16 sps:$4 sm:$0xff]  }
  0x8d   :  { %1090 = vmatprep.subr.bf16.mxu0 %v5193_v18  ;;  %1172 = vmatprep.subr.bf16.mxu1 %v5196_v21  ;;  %v5233_v48 = vld [vmem:[#allocation7 + $0x120] ss:$16 sps:$4 sm:$0xff]   ;;  %v5238_v49 = vld [vmem:[#allocation7 + $0x12c] ss:$16 sps:$4 sm:$0xff]   ;;  %v5241_v50 = vld [vmem:[#allocation7 + $0x144] ss:$16 sps:$4 sm:$0xff]  }
  0x8e   :  { %v5236_v51 = vld [vmem:[#allocation7 + $0x128] ss:$16 sps:$4 sm:$0xff]   ;;  %v5239_v52 = vld [vmem:[#allocation7 + $0x140] ss:$16 sps:$4 sm:$0xff]   ;;  %v5244_v53 = vld [vmem:[#allocation7 + $0x14c] ss:$16 sps:$4 sm:$0xff]  }
  0x8f   :  { %v5242_v54 = vld [vmem:[#allocation7 + $0x148] ss:$16 sps:$4 sm:$0xff]   ;;  %v5247_v55 = vld [vmem:[#allocation7 + $0x164] ss:$16 sps:$4 sm:$0xff]   ;;  %v5250_v56 = vld [vmem:[#allocation7 + $0x16c] ss:$16 sps:$4 sm:$0xff]  }
  0x90   :  { %1091 = vmatpush1.bf16.msra.mxu0 %v5191_v20  ;;  %1173 = vmatpush1.bf16.msra.mxu1 %v5194_v23  ;;  %v5245_v57 = vld [vmem:[#allocation7 + $0x160] ss:$16 sps:$4 sm:$0xff]   ;;  %v5248_v58 = vld [vmem:[#allocation7 + $0x168] ss:$16 sps:$4 sm:$0xff]   ;;  %v5253_v59 = vld [vmem:[#allocation7 + $0x184] ss:$16 sps:$4 sm:$0xff]  }
  0x91   :  { %1092 = vmatprep.subr.bf16.mxu0 %v5199_v22  ;;  %1174 = vmatprep.subr.bf16.mxu1 %v5202_v25  ;;  %v5256_v60 = vld [vmem:[#allocation7 + $0x18c] ss:$16 sps:$4 sm:$0xff]   ;;  %v5251_v61 = vld [vmem:[#allocation7 + $0x180] ss:$16 sps:$4 sm:$0xff]   ;;  %v5254_v62 = vld [vmem:[#allocation7 + $0x188] ss:$16 sps:$4 sm:$0xff]  }
  0x92   :  { %v5259_v63 = vld [vmem:[#allocation7 + $0x1a4] ss:$16 sps:$4 sm:$0xff]   ;;  %v5262_v0 = vld [vmem:[#allocation7 + $0x1ac] ss:$16 sps:$4 sm:$0xff]   ;;  %v5257_v1 = vld [vmem:[#allocation7 + $0x1a0] ss:$16 sps:$4 sm:$0xff]  }
  0x93   :  { %v5260_v2 = vld [vmem:[#allocation7 + $0x1a8] ss:$16 sps:$4 sm:$0xff]   ;;  %v5265_v3 = vld [vmem:[#allocation7 + $0x1c4] ss:$16 sps:$4 sm:$0xff]   ;;  %v5268_v4 = vld [vmem:[#allocation7 + $0x1cc] ss:$16 sps:$4 sm:$0xff]  }
  0x94   :  { %1093 = vmatpush1.bf16.msra.mxu0 %v5197_v24  ;;  %1175 = vmatpush1.bf16.msra.mxu1 %v5200_v27  ;;  %v5263_v5 = vld [vmem:[#allocation7 + $0x1c0] ss:$16 sps:$4 sm:$0xff]   ;;  %v5266_v6 = vld [vmem:[#allocation7 + $0x1c8] ss:$16 sps:$4 sm:$0xff]   ;;  %v5271_v7 = vld [vmem:[#allocation7 + $0x1e4] ss:$16 sps:$4 sm:$0xff]  }
  0x95   :  { %1094 = vmatprep.subr.bf16.mxu0 %v5205_v26  ;;  %1176 = vmatprep.subr.bf16.mxu1 %v5208_v29  ;;  %v5274_v8 = vld [vmem:[#allocation7 + $0x1ec] ss:$16 sps:$4 sm:$0xff]   ;;  %v5269_v9 = vld [vmem:[#allocation7 + $0x1e0] ss:$16 sps:$4 sm:$0xff]   ;;  %v5272_v10 = vld [vmem:[#allocation7 + $0x1e8] ss:$16 sps:$4 sm:$0xff]  }
  0x96   :  { %v5277_v11 = vld [vmem:[#allocation7 + $0x204] ss:$16 sps:$4 sm:$0xff]   ;;  %v5280_v12 = vld [vmem:[#allocation7 + $0x20c] ss:$16 sps:$4 sm:$0xff]   ;;  %v6293_v14 = vshrl.u32 %v126_v13, 7 }
  0x97   :  { %v6295_v15 = vld [vmem:[#allocation6] sm:$0xf]  ;;  %v5320_v13 = vld [vmem:[#allocation7 + $0x2e8] ss:$16 sps:$4 sm:$0xff]  }
  0x98   :  { %1095 = vmatpush1.bf16.msra.mxu0 %v5203_v28  ;;  %1177 = vmatpush1.bf16.msra.mxu1 %v5206_v31  ;;  %v6298_v16 = vsub.s32 0, %v6293_v14  ;;  %v6301_v17 = vsub.s32 1, %v6293_v14  ;;  %v6306_v19 = vsub.s32 3, %v6293_v14 }
  0x99   :  { %1096 = vmatprep.subr.bf16.mxu0 %v5211_v30  ;;  %1178 = vmatprep.subr.bf16.mxu1 %v5214_v33 }
  0x9a   :  { %v129_v18 = vrot.slane %v6295_v15, %v6298_v16  ;;  %v133_v20 = vrot.slane %v6295_v15, %v6301_v17  ;;  %v141_v24 = vrot.slane %v6295_v15, %v6306_v19 }
  0x9c   :  { %1097 = vmatpush1.bf16.msra.mxu0 %v5209_v32  ;;  %1179 = vmatpush1.bf16.msra.mxu1 %v5212_v35 }
  0x9d   :  { %1098 = vmatprep.subr.bf16.mxu0 %v5217_v34  ;;  %1180 = vmatprep.subr.bf16.mxu1 %v5220_v37 }
  0xa0   :  { %1099 = vmatpush1.bf16.msra.mxu0 %v5215_v36  ;;  %1181 = vmatpush1.bf16.msra.mxu1 %v5218_v39 }
  0xa1   :  { %1100 = vmatprep.subr.bf16.mxu0 %v5223_v38  ;;  %1182 = vmatprep.subr.bf16.mxu1 %v5226_v41  ;;  %v5275_v41 = vld [vmem:[#allocation7 + $0x200] ss:$16 sps:$4 sm:$0xff]  }
  0xa4   :  { %1101 = vmatpush1.bf16.msra.mxu0 %v5221_v40  ;;  %1183 = vmatpush1.bf16.msra.mxu1 %v5224_v43 }
  0xa5   :  { %1102 = vmatprep.subr.bf16.mxu0 %v5229_v42  ;;  %1184 = vmatprep.subr.bf16.mxu1 %v5232_v45  ;;  %v5278_v42 = vld [vmem:[#allocation7 + $0x208] ss:$16 sps:$4 sm:$0xff]   ;;  %v5283_v45 = vld [vmem:[#allocation7 + $0x224] ss:$16 sps:$4 sm:$0xff]  }
  0xa8   :  { %1103 = vmatpush1.bf16.msra.mxu0 %v5227_v44  ;;  %1185 = vmatpush1.bf16.msra.mxu1 %v5230_v47 }
  0xa9   :  { %1104 = vmatprep.subr.bf16.mxu0 %v5235_v46  ;;  %1186 = vmatprep.subr.bf16.mxu1 %v5238_v49  ;;  %v5286_v46 = vld [vmem:[#allocation7 + $0x22c] ss:$16 sps:$4 sm:$0xff]  }
  0xac   :  { %1105 = vmatpush1.bf16.msra.mxu0 %v5233_v48  ;;  %1187 = vmatpush1.bf16.msra.mxu1 %v5236_v51  ;;  %v5284_v51 = vld [vmem:[#allocation7 + $0x228] ss:$16 sps:$4 sm:$0xff]  }
  0xad   :  { %1106 = vmatprep.subr.bf16.mxu0 %v5241_v50  ;;  %1188 = vmatprep.subr.bf16.mxu1 %v5244_v53  ;;  %v5281_v50 = vld [vmem:[#allocation7 + $0x220] ss:$16 sps:$4 sm:$0xff]   ;;  %v5289_v53 = vld [vmem:[#allocation7 + $0x244] ss:$16 sps:$4 sm:$0xff]  }
  0xb0   :  { %1107 = vmatpush1.bf16.msra.mxu0 %v5239_v52  ;;  %1189 = vmatpush1.bf16.msra.mxu1 %v5242_v54  ;;  %v5292_v54 = vld [vmem:[#allocation7 + $0x24c] ss:$16 sps:$4 sm:$0xff]  }
  0xb1   :  { %1108 = vmatprep.subr.bf16.mxu0 %v5247_v55  ;;  %1190 = vmatprep.subr.bf16.mxu1 %v5250_v56  ;;  %v5287_v56 = vld [vmem:[#allocation7 + $0x240] ss:$16 sps:$4 sm:$0xff]  }
  0xb4   :  { %1109 = vmatpush1.bf16.msra.mxu0 %v5245_v57  ;;  %1191 = vmatpush1.bf16.msra.mxu1 %v5248_v58  ;;  %v5290_v57 = vld [vmem:[#allocation7 + $0x248] ss:$16 sps:$4 sm:$0xff]   ;;  %v5295_v58 = vld [vmem:[#allocation7 + $0x264] ss:$16 sps:$4 sm:$0xff]  }
  0xb5   :  { %1110 = vmatprep.subr.bf16.mxu0 %v5253_v59  ;;  %1192 = vmatprep.subr.bf16.mxu1 %v5256_v60  ;;  %v5298_v59 = vld [vmem:[#allocation7 + $0x26c] ss:$16 sps:$4 sm:$0xff]   ;;  %v5293_v60 = vld [vmem:[#allocation7 + $0x260] ss:$16 sps:$4 sm:$0xff]  }
  0xb8   :  { %1111 = vmatpush1.bf16.msra.mxu0 %v5251_v61  ;;  %1193 = vmatpush1.bf16.msra.mxu1 %v5254_v62  ;;  %v5296_v61 = vld [vmem:[#allocation7 + $0x268] ss:$16 sps:$4 sm:$0xff]   ;;  %v5301_v62 = vld [vmem:[#allocation7 + $0x284] ss:$16 sps:$4 sm:$0xff]  }
  0xb9   :  { %1112 = vmatprep.subr.bf16.mxu0 %v5259_v63  ;;  %1194 = vmatprep.subr.bf16.mxu1 %v5262_v0  ;;  %v5304_v63 = vld [vmem:[#allocation7 + $0x28c] ss:$16 sps:$4 sm:$0xff]   ;;  %v5299_v0 = vld [vmem:[#allocation7 + $0x280] ss:$16 sps:$4 sm:$0xff]  }
  0xbc   :  { %1113 = vmatpush1.bf16.msra.mxu0 %v5257_v1  ;;  %1195 = vmatpush1.bf16.msra.mxu1 %v5260_v2  ;;  %v5302_v1 = vld [vmem:[#allocation7 + $0x288] ss:$16 sps:$4 sm:$0xff]   ;;  %v5307_v2 = vld [vmem:[#allocation7 + $0x2a4] ss:$16 sps:$4 sm:$0xff]  }
  0xbd   :  { %1114 = vmatprep.subr.bf16.mxu0 %v5265_v3  ;;  %1196 = vmatprep.subr.bf16.mxu1 %v5268_v4  ;;  %v5310_v3 = vld [vmem:[#allocation7 + $0x2ac] ss:$16 sps:$4 sm:$0xff]   ;;  %v5305_v4 = vld [vmem:[#allocation7 + $0x2a0] ss:$16 sps:$4 sm:$0xff]  }
  0xc0   :  { %1115 = vmatpush1.bf16.msra.mxu0 %v5263_v5  ;;  %1197 = vmatpush1.bf16.msra.mxu1 %v5266_v6  ;;  %v5308_v5 = vld [vmem:[#allocation7 + $0x2a8] ss:$16 sps:$4 sm:$0xff]   ;;  %v5313_v6 = vld [vmem:[#allocation7 + $0x2c4] ss:$16 sps:$4 sm:$0xff]  }
  0xc1   :  { %1116 = vmatprep.subr.bf16.mxu0 %v5271_v7  ;;  %1198 = vmatprep.subr.bf16.mxu1 %v5274_v8  ;;  %v5316_v7 = vld [vmem:[#allocation7 + $0x2cc] ss:$16 sps:$4 sm:$0xff]   ;;  %v5311_v8 = vld [vmem:[#allocation7 + $0x2c0] ss:$16 sps:$4 sm:$0xff]  }
  0xc4   :  { %1117 = vmatpush1.bf16.msra.mxu0 %v5269_v9  ;;  %1199 = vmatpush1.bf16.msra.mxu1 %v5272_v10  ;;  %v5314_v9 = vld [vmem:[#allocation7 + $0x2c8] ss:$16 sps:$4 sm:$0xff]   ;;  %v5319_v10 = vld [vmem:[#allocation7 + $0x2e4] ss:$16 sps:$4 sm:$0xff]  }
  0xc5   :  { %1127 = vmatprep.subr.bf16.mxu0 %v5277_v11  ;;  %1209 = vmatprep.subr.bf16.mxu1 %v5280_v12  ;;  %v5322_v11 = vld [vmem:[#allocation7 + $0x2ec] ss:$16 sps:$4 sm:$0xff]   ;;  %v5317_v12 = vld [vmem:[#allocation7 + $0x2e0] ss:$16 sps:$4 sm:$0xff]  }
 0x15a   :  { %v224_v21 = vpop.f32.mrb[0].mxu0  ;;  %v6312_v29 = vpop.f32.mrb[0].mxu1 }
 0x15b   :  { %v225_v22 = vadd.f32 %v224_v21, %v129_v18  ;;  %v226_v23 = vpop.f32.mrb[1].mxu0  ;;  %v267_v31 = vpop.f32.mrb[1].mxu1  ;;  %v6315_v18 = vsub.s32 2, %v6293_v14  ;;  %v5328_v21 = vld [vmem:[#allocation7 + $0x30c] ss:$16 sps:$4 sm:$0xff]  }
 0x15c   :  { %v227_v25 = vadd.f32 %v226_v23, %v133_v20  ;;  %v228_v26 = vpop.f32.mrb[2].mxu0  ;;  %v268_v32 = vadd.f32 %v267_v31, %v141_v24  ;;  %v269_v33 = vpop.f32.mrb[2].mxu1  ;;  %v5325_v20 = vld [vmem:[#allocation7 + $0x304] ss:$16 sps:$4 sm:$0xff]   ;;  %v5326_v23 = vld [vmem:[#allocation7 + $0x308] ss:$16 sps:$4 sm:$0xff]  }
 0x15d   :  { %v276_v27 = vmul.f32 1.442695, %v225_v22  ;;  %v229_v28 = vpop.f32.mrb[3].mxu0  ;;  %v270_v34 = vpop.f32.mrb[3].mxu1  ;;  %vm272_vm1 = vcmp.gt.f32.partialorder %v225_v22, 0.0  ;;  %v137_v24 = vrot.slane %v6295_v15, %v6315_v18 }
 0x15e   :  { %v278_v30 = vmul.f32 1.442695, %v227_v25  ;;  %v282_v35 = vmul.f32 1.442695, %v268_v32  ;;  %vm273_vm2 = vcmp.gt.f32.partialorder %v227_v25, 0.0  ;;  %vm275_vm3 = vcmp.gt.f32.partialorder %v268_v32, 0.0 }
 0x15f   :  { %5979 = vpow2.f32 %v276_v27  ;;  %v5334_v26 = vld [vmem:[#allocation7 + $0x32c] ss:$16 sps:$4 sm:$0xff]   ;;  %v5329_v27 = vld [vmem:[#allocation7 + $0x320] ss:$16 sps:$4 sm:$0xff]   ;;  %v5332_v14 = vld [vmem:[#allocation7 + $0x328] ss:$16 sps:$4 sm:$0xff]   ;;  %v266_v28 = vadd.f32 %v6312_v29, %v137_v24 }
 0x160   :  { %5981 = vpow2.f32 %v278_v30  ;;  %v5337_v30 = vld [vmem:[#allocation7 + $0x344] ss:$16 sps:$4 sm:$0xff]   ;;  %v5340_v31 = vld [vmem:[#allocation7 + $0x34c] ss:$16 sps:$4 sm:$0xff]   ;;  %v5338_v33 = vld [vmem:[#allocation7 + $0x348] ss:$16 sps:$4 sm:$0xff]  }
 0x161   :  { %5983 = vpow2.f32 %v282_v35  ;;  %v280_v34 = vmul.f32 1.442695, %v266_v28  ;;  %v5343_v15 = vld [vmem:[#allocation7 + $0x364] ss:$16 sps:$4 sm:$0xff]   ;;  %v5346_v35 = vld [vmem:[#allocation7 + $0x36c] ss:$16 sps:$4 sm:$0xff]  }
 0x162   :  { %v5349_v29 = vld [vmem:[#allocation7 + $0x384] ss:$16 sps:$4 sm:$0xff]   ;;  %vm274_vm4 = vcmp.gt.f32.partialorder %v266_v28, 0.0 }
 0x163   :  { %5985 = vpow2.f32 %v280_v34  ;;  %v5412_v24 = vld [vmem:[#allocation10 + $0x27c] ss:$52 sps:$4 sm:$0xff]  }
 0x164   :  { %v5422_v34 = vld [vmem:[#allocation10 + $0x348] ss:$52 sps:$4 sm:$0xff]  }
 0x169   :  { %v5980_v36 = vpop.eup %5979 }
 0x16a   :  { %v5982_v37 = vpop.eup %5981  ;;  %v4510_v38 = vadd.f32 -1.0, %v5980_v36  ;;  %v5341_v36 = vld [vmem:[#allocation7 + $0x360] ss:$16 sps:$4 sm:$0xff]  }
 0x16b   :  { %v4511_v39 = vadd.f32 -1.0, %v5982_v37  ;;  %v5984_v43 = vpop.eup %5983  ;;  %v5344_v37 = vld [vmem:[#allocation7 + $0x368] ss:$16 sps:$4 sm:$0xff]  }
 0x16c   :  { %v288_v40 = vsel %vm272_vm1, %v225_v22, %v4510_v38  ;;  %v4513_v48 = vadd.f32 -1.0, %v5984_v43  ;;  %v5323_v22 = vld [vmem:[#allocation7 + $0x300] ss:$16 sps:$4 sm:$0xff]   ;;  %v5352_v38 = vld [vmem:[#allocation7 + $0x38c] ss:$16 sps:$4 sm:$0xff]  }
 0x16d   :  { %v289_v44 = vsel %vm273_vm2, %v227_v25, %v4511_v39  ;;  %v292_v49 = vpack.c.bf16 %v288_v40, %v288_v40  ;;  %v5331_v25 = vld [vmem:[#allocation7 + $0x324] ss:$16 sps:$4 sm:$0xff]   ;;  %v5347_v39 = vld [vmem:[#allocation7 + $0x380] ss:$16 sps:$4 sm:$0xff]   ;;  %v5350_v40 = vld [vmem:[#allocation7 + $0x388] ss:$16 sps:$4 sm:$0xff]  }
 0x16e   :  { %v293_v47 = vpack.c.bf16 %v289_v44, %v289_v44  ;;  %v291_v52 = vsel %vm275_vm3, %v268_v32, %v4513_v48  ;;  %v5335_v32 = vld [vmem:[#allocation7 + $0x340] ss:$16 sps:$4 sm:$0xff]   ;;  %v5356_v44 = vld [vmem:[#allocation7 + $0x3a8] ss:$16 sps:$4 sm:$0xff]  }
 0x16f   :  { %v295_v55 = vpack.c.bf16 %v291_v52, %v291_v52  ;;  %v5353_v43 = vld [vmem:[#allocation7 + $0x3a0] ss:$16 sps:$4 sm:$0xff]  }
 0x170   :  { %1118 = vmatprep.mubr.bf16.mxu0 %v293_v47  ;;  %1200 = vmatprep.mubr.bf16.mxu1 %v293_v47  ;;  %v5986_v47 = vpop.eup %5985  ;;  %v5359_v48 = vld [vmem:[#allocation7 + $0x3c0] ss:$16 sps:$4 sm:$0xff]  }
 0x171   :  { %1119 = vmatmul.mubr.bf16.vlgmr.msra.gmra.mrb[4].mxu0 %v292_v49  ;;  %1201 = vmatmul.mubr.bf16.vlgmr.msra.gmra.mrb[4].mxu1 %v292_v49  ;;  %v5362_v49 = vld [vmem:[#allocation7 + $0x3c8] ss:$16 sps:$4 sm:$0xff]   ;;  %v4512_v52 = vadd.f32 -1.0, %v5986_v47 }
 0x172   :  { %1128 = vmatpush1.bf16.msra.mxu0 %v5275_v41  ;;  %1210 = vmatpush1.bf16.msra.mxu1 %v5278_v42  ;;  %v5355_v41 = vld [vmem:[#allocation7 + $0x3a4] ss:$16 sps:$4 sm:$0xff]   ;;  %v5358_v42 = vld [vmem:[#allocation7 + $0x3ac] ss:$16 sps:$4 sm:$0xff]  }
 0x173   :  { %1129 = vmatprep.subr.bf16.mxu0 %v5283_v45  ;;  %1211 = vmatprep.subr.bf16.mxu1 %v5286_v46  ;;  %v5361_v45 = vld [vmem:[#allocation7 + $0x3c4] ss:$16 sps:$4 sm:$0xff]   ;;  %v5364_v46 = vld [vmem:[#allocation7 + $0x3cc] ss:$16 sps:$4 sm:$0xff]  }
 0x174   :  { %1159 = vmatprep.mubr.bf16.mxu0 %v295_v55  ;;  %1241 = vmatprep.mubr.bf16.mxu1 %v295_v55  ;;  %v5373_v55 = vld [vmem:[#allocation10 + $0x4] ss:$52 sps:$4 sm:$0xff]   ;;  %v5443_v47 = vld [vmem:[#allocation10 + $0x4e0] ss:$52 sps:$4 sm:$0xff]  }
 0x176   :  { %1130 = vmatpush1.bf16.msra.mxu0 %v5281_v50  ;;  %1212 = vmatpush1.bf16.msra.mxu1 %v5284_v51  ;;  %v5367_v50 = vld [vmem:[#allocation7 + $0x3e4] ss:$16 sps:$4 sm:$0xff]   ;;  %v5370_v51 = vld [vmem:[#allocation7 + $0x3ec] ss:$16 sps:$4 sm:$0xff]  }
 0x177   :  { %1131 = vmatprep.subr.bf16.mxu0 %v5289_v53  ;;  %1213 = vmatprep.subr.bf16.mxu1 %v5292_v54  ;;  %v5365_v53 = vld [vmem:[#allocation7 + $0x3e0] ss:$16 sps:$4 sm:$0xff]   ;;  %v5368_v54 = vld [vmem:[#allocation7 + $0x3e8] ss:$16 sps:$4 sm:$0xff]  }
 0x17a   :  { %1132 = vmatpush1.bf16.msra.mxu0 %v5287_v56  ;;  %1214 = vmatpush1.bf16.msra.mxu1 %v5290_v57  ;;  %v5376_v56 = vld [vmem:[#allocation10 + $0xc] ss:$52 sps:$4 sm:$0xff]   ;;  %v290_v57 = vsel %vm274_vm4, %v266_v28, %v4512_v52  ;;  %v5452_v52 = vld [vmem:[#allocation10 + $0x550] ss:$52 sps:$4 sm:$0xff]  }
 0x17b   :  { %1133 = vmatprep.subr.bf16.mxu0 %v5295_v58  ;;  %1215 = vmatprep.subr.bf16.mxu1 %v5298_v59  ;;  %v5371_v58 = vld [vmem:[#allocation10] ss:$52 sps:$4 sm:$0xff]   ;;  %v5374_v59 = vld [vmem:[#allocation10 + $0x8] ss:$52 sps:$4 sm:$0xff]   ;;  %v5413_v28 = vld [vmem:[#allocation10 + $0x2d8] ss:$52 sps:$4 sm:$0xff]  }
 0x17e   :  { %1134 = vmatpush1.bf16.msra.mxu0 %v5293_v60  ;;  %1216 = vmatpush1.bf16.msra.mxu1 %v5296_v61  ;;  %v294_v60 = vpack.c.bf16 %v290_v57, %v290_v57  ;;  %v5379_v61 = vld [vmem:[#allocation10 + $0x6c] ss:$52 sps:$4 sm:$0xff]   ;;  %v5463_v57 = vld [vmem:[#allocation10 + $0x61c] ss:$52 sps:$4 sm:$0xff]  }
 0x17f   :  { %1135 = vmatprep.subr.bf16.mxu0 %v5301_v62  ;;  %1217 = vmatprep.subr.bf16.mxu1 %v5304_v63  ;;  %v5382_v62 = vld [vmem:[#allocation10 + $0x74] ss:$52 sps:$4 sm:$0xff]  }
 0x180   :  { %v5377_v63 = vld [vmem:[#allocation10 + $0x68] ss:$52 sps:$4 sm:$0xff]  }
 0x182   :  { %1136 = vmatpush1.bf16.msra.mxu0 %v5299_v0  ;;  %1218 = vmatpush1.bf16.msra.mxu1 %v5302_v1  ;;  %v5380_v0 = vld [vmem:[#allocation10 + $0x70] ss:$52 sps:$4 sm:$0xff]   ;;  %v5385_v1 = vld [vmem:[#allocation10 + $0xd4] ss:$52 sps:$4 sm:$0xff]  }
 0x183   :  { %1137 = vmatprep.subr.bf16.mxu0 %v5307_v2  ;;  %1219 = vmatprep.subr.bf16.mxu1 %v5310_v3  ;;  %v5388_v2 = vld [vmem:[#allocation10 + $0xdc] ss:$52 sps:$4 sm:$0xff]  }
 0x184   :  { %v5383_v3 = vld [vmem:[#allocation10 + $0xd0] ss:$52 sps:$4 sm:$0xff]  }
 0x186   :  { %1138 = vmatpush1.bf16.msra.mxu0 %v5305_v4  ;;  %1220 = vmatpush1.bf16.msra.mxu1 %v5308_v5  ;;  %v5386_v4 = vld [vmem:[#allocation10 + $0xd8] ss:$52 sps:$4 sm:$0xff]   ;;  %v5391_v5 = vld [vmem:[#allocation10 + $0x13c] ss:$52 sps:$4 sm:$0xff]  }
 0x187   :  { %1139 = vmatprep.subr.bf16.mxu0 %v5313_v6  ;;  %1221 = vmatprep.subr.bf16.mxu1 %v5316_v7  ;;  %v5394_v6 = vld [vmem:[#allocation10 + $0x144] ss:$52 sps:$4 sm:$0xff]  }
 0x188   :  { %v5389_v7 = vld [vmem:[#allocation10 + $0x138] ss:$52 sps:$4 sm:$0xff]  }
 0x18a   :  { %1140 = vmatpush1.bf16.msra.mxu0 %v5311_v8  ;;  %1222 = vmatpush1.bf16.msra.mxu1 %v5314_v9  ;;  %v5392_v8 = vld [vmem:[#allocation10 + $0x140] ss:$52 sps:$4 sm:$0xff]   ;;  %v5397_v9 = vld [vmem:[#allocation10 + $0x1a4] ss:$52 sps:$4 sm:$0xff]  }
 0x18b   :  { %1141 = vmatprep.subr.bf16.mxu0 %v5319_v10  ;;  %1223 = vmatprep.subr.bf16.mxu1 %v5322_v11  ;;  %v5400_v10 = vld [vmem:[#allocation10 + $0x1ac] ss:$52 sps:$4 sm:$0xff]  }
 0x18c   :  { %v5395_v11 = vld [vmem:[#allocation10 + $0x1a0] ss:$52 sps:$4 sm:$0xff]  }
 0x18e   :  { %1142 = vmatpush1.bf16.msra.mxu0 %v5317_v12  ;;  %1224 = vmatpush1.bf16.msra.mxu1 %v5320_v13  ;;  %v5398_v12 = vld [vmem:[#allocation10 + $0x1a8] ss:$52 sps:$4 sm:$0xff]   ;;  %v5403_v13 = vld [vmem:[#allocation10 + $0x20c] ss:$52 sps:$4 sm:$0xff]  }
 0x18f   :  { %1143 = vmatprep.subr.bf16.mxu0 %v5325_v20  ;;  %1225 = vmatprep.subr.bf16.mxu1 %v5328_v21  ;;  %v5406_v20 = vld [vmem:[#allocation10 + $0x214] ss:$52 sps:$4 sm:$0xff]  }
 0x190   :  { %v5401_v21 = vld [vmem:[#allocation10 + $0x208] ss:$52 sps:$4 sm:$0xff]  }
 0x192   :  { %1144 = vmatpush1.bf16.msra.mxu0 %v5323_v22  ;;  %1226 = vmatpush1.bf16.msra.mxu1 %v5326_v23  ;;  %v5404_v22 = vld [vmem:[#allocation10 + $0x210] ss:$52 sps:$4 sm:$0xff]   ;;  %v5409_v23 = vld [vmem:[#allocation10 + $0x274] ss:$52 sps:$4 sm:$0xff]  }
 0x193   :  { %1145 = vmatprep.subr.bf16.mxu0 %v5331_v25  ;;  %1227 = vmatprep.subr.bf16.mxu1 %v5334_v26  ;;  %v5407_v25 = vld [vmem:[#allocation10 + $0x270] ss:$52 sps:$4 sm:$0xff]   ;;  %v5410_v26 = vld [vmem:[#allocation10 + $0x278] ss:$52 sps:$4 sm:$0xff]  }
 0x196   :  { %1146 = vmatpush1.bf16.msra.mxu0 %v5329_v27  ;;  %1228 = vmatpush1.bf16.msra.mxu1 %v5332_v14  ;;  %v5415_v27 = vld [vmem:[#allocation10 + $0x2dc] ss:$52 sps:$4 sm:$0xff]   ;;  %v5418_v14 = vld [vmem:[#allocation10 + $0x2e4] ss:$52 sps:$4 sm:$0xff]  }
 0x197   :  { %1147 = vmatprep.subr.bf16.mxu0 %v5337_v30  ;;  %1229 = vmatprep.subr.bf16.mxu1 %v5340_v31  ;;  %v5416_v30 = vld [vmem:[#allocation10 + $0x2e0] ss:$52 sps:$4 sm:$0xff]   ;;  %v5421_v31 = vld [vmem:[#allocation10 + $0x344] ss:$52 sps:$4 sm:$0xff]  }
 0x19a   :  { %1148 = vmatpush1.bf16.msra.mxu0 %v5335_v32  ;;  %1230 = vmatpush1.bf16.msra.mxu1 %v5338_v33  ;;  %v5424_v32 = vld [vmem:[#allocation10 + $0x34c] ss:$52 sps:$4 sm:$0xff]  }
 0x19b   :  { %1149 = vmatprep.subr.bf16.mxu0 %v5343_v15  ;;  %1231 = vmatprep.subr.bf16.mxu1 %v5346_v35  ;;  %v5419_v33 = vld [vmem:[#allocation10 + $0x340] ss:$52 sps:$4 sm:$0xff]  }
 0x19c   :  { %v5427_v15 = vld [vmem:[#allocation10 + $0x3ac] ss:$52 sps:$4 sm:$0xff]   ;;  %v5430_v35 = vld [vmem:[#allocation10 + $0x3b4] ss:$52 sps:$4 sm:$0xff]  }
 0x19e   :  { %1150 = vmatpush1.bf16.msra.mxu0 %v5341_v36  ;;  %1232 = vmatpush1.bf16.msra.mxu1 %v5344_v37  ;;  %v5425_v36 = vld [vmem:[#allocation10 + $0x3a8] ss:$52 sps:$4 sm:$0xff]   ;;  %v5428_v37 = vld [vmem:[#allocation10 + $0x3b0] ss:$52 sps:$4 sm:$0xff]  }
 0x19f   :  { %1151 = vmatprep.subr.bf16.mxu0 %v5349_v29  ;;  %1233 = vmatprep.subr.bf16.mxu1 %v5352_v38  ;;  %v5433_v29 = vld [vmem:[#allocation10 + $0x414] ss:$52 sps:$4 sm:$0xff]   ;;  %v5436_v38 = vld [vmem:[#allocation10 + $0x41c] ss:$52 sps:$4 sm:$0xff]  }
 0x1a2   :  { %1152 = vmatpush1.bf16.msra.mxu0 %v5347_v39  ;;  %1234 = vmatpush1.bf16.msra.mxu1 %v5350_v40  ;;  %v5431_v39 = vld [vmem:[#allocation10 + $0x410] ss:$52 sps:$4 sm:$0xff]   ;;  %v5434_v40 = vld [vmem:[#allocation10 + $0x418] ss:$52 sps:$4 sm:$0xff]  }
 0x1a3   :  { %1153 = vmatprep.subr.bf16.mxu0 %v5355_v41  ;;  %1235 = vmatprep.subr.bf16.mxu1 %v5358_v42  ;;  %v5439_v41 = vld [vmem:[#allocation10 + $0x47c] ss:$52 sps:$4 sm:$0xff]   ;;  %v5442_v42 = vld [vmem:[#allocation10 + $0x484] ss:$52 sps:$4 sm:$0xff]  }
 0x1a6   :  { %1154 = vmatpush1.bf16.msra.mxu0 %v5353_v43  ;;  %1236 = vmatpush1.bf16.msra.mxu1 %v5356_v44  ;;  %v5437_v43 = vld [vmem:[#allocation10 + $0x478] ss:$52 sps:$4 sm:$0xff]   ;;  %v5440_v44 = vld [vmem:[#allocation10 + $0x480] ss:$52 sps:$4 sm:$0xff]  }
 0x1a7   :  { %1155 = vmatprep.subr.bf16.mxu0 %v5361_v45  ;;  %1237 = vmatprep.subr.bf16.mxu1 %v5364_v46  ;;  %v5445_v45 = vld [vmem:[#allocation10 + $0x4e4] ss:$52 sps:$4 sm:$0xff]   ;;  %v5448_v46 = vld [vmem:[#allocation10 + $0x4ec] ss:$52 sps:$4 sm:$0xff]  }
 0x1aa   :  { %1156 = vmatpush1.bf16.msra.mxu0 %v5359_v48  ;;  %1238 = vmatpush1.bf16.msra.mxu1 %v5362_v49  ;;  %v5446_v48 = vld [vmem:[#allocation10 + $0x4e8] ss:$52 sps:$4 sm:$0xff]   ;;  %v5451_v49 = vld [vmem:[#allocation10 + $0x54c] ss:$52 sps:$4 sm:$0xff]  }
 0x1ab   :  { %1157 = vmatprep.subr.bf16.mxu0 %v5367_v50  ;;  %1239 = vmatprep.subr.bf16.mxu1 %v5370_v51  ;;  %v5454_v50 = vld [vmem:[#allocation10 + $0x554] ss:$52 sps:$4 sm:$0xff]  }
 0x1ac   :  { %v5449_v51 = vld [vmem:[#allocation10 + $0x548] ss:$52 sps:$4 sm:$0xff]  }
 0x1ae   :  { %1158 = vmatpush1.bf16.msra.mxu0 %v5365_v53  ;;  %1240 = vmatpush1.bf16.msra.mxu1 %v5368_v54  ;;  %v5457_v53 = vld [vmem:[#allocation10 + $0x5b4] ss:$52 sps:$4 sm:$0xff]   ;;  %v5460_v54 = vld [vmem:[#allocation10 + $0x5bc] ss:$52 sps:$4 sm:$0xff]  }
 0x1af   :  { %2064 = vmatprep.subr.bf16.mxu0 %v5373_v55  ;;  %2146 = vmatprep.subr.bf16.mxu1 %v5376_v56  ;;  %v5455_v55 = vld [vmem:[#allocation10 + $0x5b0] ss:$52 sps:$4 sm:$0xff]   ;;  %v5458_v56 = vld [vmem:[#allocation10 + $0x5b8] ss:$52 sps:$4 sm:$0xff]  }
 0x1b1   :  { %1160 = vmatmul.mubr.bf16.vlgmr.msra.gmra.mrb[4].mxu0 %v294_v60  ;;  %1242 = vmatmul.mubr.bf16.vlgmr.msra.gmra.mrb[4].mxu1 %v294_v60  ;;  %v5464_v60 = vld [vmem:[#allocation10 + $0x620] ss:$52 sps:$4 sm:$0xff]  }
 0x1b2   :  { %2065 = vmatpush1.bf16.msra.mxu0 %v5371_v58  ;;  %2147 = vmatpush1.bf16.msra.mxu1 %v5374_v59  ;;  %v5466_v58 = vld [vmem:[#allocation10 + $0x624] ss:$52 sps:$4 sm:$0xff]  }
 0x1b3   :  { %2066 = vmatprep.subr.bf16.mxu0 %v5379_v61  ;;  %2148 = vmatprep.subr.bf16.mxu1 %v5382_v62  ;;  %v5461_v59 = vld [vmem:[#allocation10 + $0x618] ss:$52 sps:$4 sm:$0xff]  }
 0x1b4   :  { %v5469_v61 = vld [vmem:[#allocation10 + $0x684] ss:$52 sps:$4 sm:$0xff]   ;;  %v5472_v62 = vld [vmem:[#allocation10 + $0x68c] ss:$52 sps:$4 sm:$0xff]  }
 0x1b6   :  { %2067 = vmatpush1.bf16.msra.mxu0 %v5377_v63  ;;  %2149 = vmatpush1.bf16.msra.mxu1 %v5380_v0  ;;  %v6320_v63 = vld [vmem:[#allocation9] sm:$0xf] }
 0x1b7   :  { %2068 = vmatprep.subr.bf16.mxu0 %v5385_v1  ;;  %2150 = vmatprep.subr.bf16.mxu1 %v5388_v2  ;;  %v429_v0 = vrot.slane %v6320_v63, %v6298_v16  ;;  %v433_v1 = vrot.slane %v6320_v63, %v6301_v17  ;;  %v441_v2 = vrot.slane %v6320_v63, %v6306_v19 }
 0x1ba   :  { %2069 = vmatpush1.bf16.msra.mxu0 %v5383_v3  ;;  %2151 = vmatpush1.bf16.msra.mxu1 %v5386_v4 }
 0x1bb   :  { %2070 = vmatprep.subr.bf16.mxu0 %v5391_v5  ;;  %2152 = vmatprep.subr.bf16.mxu1 %v5394_v6 }
 0x1be   :  { %2071 = vmatpush1.bf16.msra.mxu0 %v5389_v7  ;;  %2153 = vmatpush1.bf16.msra.mxu1 %v5392_v8 }
 0x1bf   :  { %2072 = vmatprep.subr.bf16.mxu0 %v5397_v9  ;;  %2154 = vmatprep.subr.bf16.mxu1 %v5400_v10 }
 0x1c2   :  { %2073 = vmatpush1.bf16.msra.mxu0 %v5395_v11  ;;  %2155 = vmatpush1.bf16.msra.mxu1 %v5398_v12 }
 0x1c3   :  { %2074 = vmatprep.subr.bf16.mxu0 %v5403_v13  ;;  %2156 = vmatprep.subr.bf16.mxu1 %v5406_v20 }
 0x1c6   :  { %2075 = vmatpush1.bf16.msra.mxu0 %v5401_v21  ;;  %2157 = vmatpush1.bf16.msra.mxu1 %v5404_v22 }
 0x1c7   :  { %2076 = vmatprep.subr.bf16.mxu0 %v5409_v23  ;;  %2158 = vmatprep.subr.bf16.mxu1 %v5412_v24 }
 0x1ca   :  { %2077 = vmatpush1.bf16.msra.mxu0 %v5407_v25  ;;  %2159 = vmatpush1.bf16.msra.mxu1 %v5410_v26 }
 0x1cb   :  { %2078 = vmatprep.subr.bf16.mxu0 %v5415_v27  ;;  %2160 = vmatprep.subr.bf16.mxu1 %v5418_v14 }
 0x1ce   :  { %2079 = vmatpush1.bf16.msra.mxu0 %v5413_v28  ;;  %2161 = vmatpush1.bf16.msra.mxu1 %v5416_v30 }
 0x1cf   :  { %2080 = vmatprep.subr.bf16.mxu0 %v5421_v31  ;;  %2162 = vmatprep.subr.bf16.mxu1 %v5424_v32 }
 0x1d2   :  { %2081 = vmatpush1.bf16.msra.mxu0 %v5419_v33  ;;  %2163 = vmatpush1.bf16.msra.mxu1 %v5422_v34  ;;  %v5467_v33 = vld [vmem:[#allocation10 + $0x680] ss:$52 sps:$4 sm:$0xff]   ;;  %v5470_v34 = vld [vmem:[#allocation10 + $0x688] ss:$52 sps:$4 sm:$0xff]  }
 0x1d3   :  { %2082 = vmatprep.subr.bf16.mxu0 %v5427_v15  ;;  %2164 = vmatprep.subr.bf16.mxu1 %v5430_v35  ;;  %v5475_v35 = vld [vmem:[#allocation10 + $0x6ec] ss:$52 sps:$4 sm:$0xff]  }
 0x1d6   :  { %2083 = vmatpush1.bf16.msra.mxu0 %v5425_v36  ;;  %2165 = vmatpush1.bf16.msra.mxu1 %v5428_v37  ;;  %v5478_v36 = vld [vmem:[#allocation10 + $0x6f4] ss:$52 sps:$4 sm:$0xff]  }
 0x1d7   :  { %2084 = vmatprep.subr.bf16.mxu0 %v5433_v29  ;;  %2166 = vmatprep.subr.bf16.mxu1 %v5436_v38  ;;  %v5473_v29 = vld [vmem:[#allocation10 + $0x6e8] ss:$52 sps:$4 sm:$0xff]   ;;  %v5476_v38 = vld [vmem:[#allocation10 + $0x6f0] ss:$52 sps:$4 sm:$0xff]  }
 0x1da   :  { %2085 = vmatpush1.bf16.msra.mxu0 %v5431_v39  ;;  %2167 = vmatpush1.bf16.msra.mxu1 %v5434_v40  ;;  %v5481_v39 = vld [vmem:[#allocation10 + $0x754] ss:$52 sps:$4 sm:$0xff]   ;;  %v5484_v40 = vld [vmem:[#allocation10 + $0x75c] ss:$52 sps:$4 sm:$0xff]  }
 0x1db   :  { %2086 = vmatprep.subr.bf16.mxu0 %v5439_v41  ;;  %2168 = vmatprep.subr.bf16.mxu1 %v5442_v42  ;;  %v5479_v41 = vld [vmem:[#allocation10 + $0x750] ss:$52 sps:$4 sm:$0xff]   ;;  %v5482_v42 = vld [vmem:[#allocation10 + $0x758] ss:$52 sps:$4 sm:$0xff]  }
 0x1de   :  { %2087 = vmatpush1.bf16.msra.mxu0 %v5437_v43  ;;  %2169 = vmatpush1.bf16.msra.mxu1 %v5440_v44  ;;  %v5487_v43 = vld [vmem:[#allocation10 + $0x7bc] ss:$52 sps:$4 sm:$0xff]   ;;  %v5490_v44 = vld [vmem:[#allocation10 + $0x7c4] ss:$52 sps:$4 sm:$0xff]  }
 0x1df   :  { %2088 = vmatprep.subr.bf16.mxu0 %v5445_v45  ;;  %2170 = vmatprep.subr.bf16.mxu1 %v5448_v46  ;;  %v5485_v45 = vld [vmem:[#allocation10 + $0x7b8] ss:$52 sps:$4 sm:$0xff]   ;;  %v5488_v46 = vld [vmem:[#allocation10 + $0x7c0] ss:$52 sps:$4 sm:$0xff]  }
 0x1e2   :  { %2089 = vmatpush1.bf16.msra.mxu0 %v5443_v47  ;;  %2171 = vmatpush1.bf16.msra.mxu1 %v5446_v48  ;;  %v5493_v47 = vld [vmem:[#allocation10 + $0x824] ss:$52 sps:$4 sm:$0xff]   ;;  %v5496_v48 = vld [vmem:[#allocation10 + $0x82c] ss:$52 sps:$4 sm:$0xff]  }
 0x1e3   :  { %2090 = vmatprep.subr.bf16.mxu0 %v5451_v49  ;;  %2172 = vmatprep.subr.bf16.mxu1 %v5454_v50  ;;  %v5491_v49 = vld [vmem:[#allocation10 + $0x820] ss:$52 sps:$4 sm:$0xff]   ;;  %v5494_v50 = vld [vmem:[#allocation10 + $0x828] ss:$52 sps:$4 sm:$0xff]  }
 0x1e6   :  { %2091 = vmatpush1.bf16.msra.mxu0 %v5449_v51  ;;  %2173 = vmatpush1.bf16.msra.mxu1 %v5452_v52  ;;  %v5499_v51 = vld [vmem:[#allocation10 + $0x88c] ss:$52 sps:$4 sm:$0xff]   ;;  %v5502_v52 = vld [vmem:[#allocation10 + $0x894] ss:$52 sps:$4 sm:$0xff]  }
 0x1e7   :  { %2092 = vmatprep.subr.bf16.mxu0 %v5457_v53  ;;  %2174 = vmatprep.subr.bf16.mxu1 %v5460_v54  ;;  %v5497_v53 = vld [vmem:[#allocation10 + $0x888] ss:$52 sps:$4 sm:$0xff]   ;;  %v5500_v54 = vld [vmem:[#allocation10 + $0x890] ss:$52 sps:$4 sm:$0xff]  }
 0x1ea   :  { %2093 = vmatpush1.bf16.msra.mxu0 %v5455_v55  ;;  %2175 = vmatpush1.bf16.msra.mxu1 %v5458_v56  ;;  %v5505_v55 = vld [vmem:[#allocation10 + $0x8f4] ss:$52 sps:$4 sm:$0xff]   ;;  %v5508_v56 = vld [vmem:[#allocation10 + $0x8fc] ss:$52 sps:$4 sm:$0xff]  }
 0x1eb   :  { %2094 = vmatprep.subr.bf16.mxu0 %v5463_v57  ;;  %2176 = vmatprep.subr.bf16.mxu1 %v5466_v58  ;;  %v5503_v57 = vld [vmem:[#allocation10 + $0x8f0] ss:$52 sps:$4 sm:$0xff]   ;;  %v5506_v58 = vld [vmem:[#allocation10 + $0x8f8] ss:$52 sps:$4 sm:$0xff]  }
 0x1ee   :  { %2095 = vmatpush1.bf16.msra.mxu0 %v5461_v59  ;;  %2177 = vmatpush1.bf16.msra.mxu1 %v5464_v60  ;;  %v5511_v59 = vld [vmem:[#allocation10 + $0x95c] ss:$52 sps:$4 sm:$0xff]   ;;  %v5514_v60 = vld [vmem:[#allocation10 + $0x964] ss:$52 sps:$4 sm:$0xff]  }
 0x1ef   :  { %2105 = vmatprep.subr.bf16.mxu0 %v5469_v61  ;;  %2187 = vmatprep.subr.bf16.mxu1 %v5472_v62  ;;  %v5509_v61 = vld [vmem:[#allocation10 + $0x958] ss:$52 sps:$4 sm:$0xff]   ;;  %v5512_v62 = vld [vmem:[#allocation10 + $0x960] ss:$52 sps:$4 sm:$0xff]  }
 0x284   :  { %v1161_v3 = vpop.f32.mrb[4].mxu0  ;;  %v6328_v4 = vpop.f32.mrb[4].mxu1 }
 0x285   :  { %v5107_v5 = vadd.f32 %v1161_v3, %v429_v0  ;;  %v1163_v6 = vpop.f32.mrb[5].mxu0  ;;  %v1245_v7 = vpop.f32.mrb[5].mxu1  ;;  %v5517_v0 = vld [vmem:[#allocation10 + $0x9c4] ss:$52 sps:$4 sm:$0xff]   ;;  %v5518_v3 = vld [vmem:[#allocation10 + $0x9c8] ss:$52 sps:$4 sm:$0xff]  }
 0x286   :  { %v5108_v8 = vadd.f32 %v1163_v6, %v433_v1  ;;  %v5110_v9 = vadd.f32 %v1245_v7, %v441_v2  ;;  %v1165_v10 = vpop.f32.mrb[6].mxu0  ;;  %v1247_v11 = vpop.f32.mrb[6].mxu1  ;;  %v5520_v1 = vld [vmem:[#allocation10 + $0x9cc] ss:$52 sps:$4 sm:$0xff]   ;;  %v5526_v7 = vld [vmem:[#allocation10 + $0xa34] ss:$52 sps:$4 sm:$0xff]  }
 0x287   :  { %v1254_v12 = vmul.f32 1.442695, %v5107_v5  ;;  %v1166_v21 = vpop.f32.mrb[7].mxu0  ;;  %v1248_v22 = vpop.f32.mrb[7].mxu1  ;;  %vm1250_vm5 = vcmp.gt.f32.partialorder %v5107_v5, 0.0 }
 0x288   :  { %v1256_v13 = vmul.f32 1.442695, %v5108_v8  ;;  %v1260_v20 = vmul.f32 1.442695, %v5110_v9  ;;  %vm1251_vm6 = vcmp.gt.f32.partialorder %v5108_v8, 0.0  ;;  %vm1253_vm7 = vcmp.gt.f32.partialorder %v5110_v9, 0.0 }
 0x289   :  { %5987 = vpow2.f32 %v1254_v12  ;;  %v5515_v2 = vld [vmem:[#allocation10 + $0x9c0] ss:$52 sps:$4 sm:$0xff]   ;;  %v5532_v12 = vld [vmem:[#allocation10 + $0xa9c] ss:$52 sps:$4 sm:$0xff]   ;;  %v5538_v22 = vld [vmem:[#allocation10 + $0xb04] ss:$52 sps:$4 sm:$0xff]  }
 0x28a   :  { %5989 = vpow2.f32 %v1256_v13  ;;  %v5523_v6 = vld [vmem:[#allocation10 + $0xa2c] ss:$52 sps:$4 sm:$0xff]   ;;  %v5529_v11 = vld [vmem:[#allocation10 + $0xa94] ss:$52 sps:$4 sm:$0xff]   ;;  %v5527_v13 = vld [vmem:[#allocation10 + $0xa90] ss:$52 sps:$4 sm:$0xff]  }
 0x28b   :  { %5991 = vpow2.f32 %v1260_v20  ;;  %v5530_v20 = vld [vmem:[#allocation10 + $0xa98] ss:$52 sps:$4 sm:$0xff]  }
 0x293   :  { %v5988_v23 = vpop.eup %5987 }
 0x294   :  { %v4642_v24 = vadd.f32 -1.0, %v5988_v23  ;;  %v5990_v25 = vpop.eup %5989  ;;  %v5533_v23 = vld [vmem:[#allocation10 + $0xaf8] ss:$52 sps:$4 sm:$0xff]  }
 0x295   :  { %v5992_v26 = vpop.eup %5991  ;;  %v4643_v27 = vadd.f32 -1.0, %v5990_v25  ;;  %v5544_v25 = vld [vmem:[#allocation10 + $0xb6c] ss:$52 sps:$4 sm:$0xff]  }
 0x296   :  { %v1266_v14 = vsel %vm1250_vm5, %v5107_v5, %v4642_v24  ;;  %v4645_v28 = vadd.f32 -1.0, %v5992_v26  ;;  %v437_v5 = vrot.slane %v6320_v63, %v6315_v18  ;;  %v5535_v63 = vld [vmem:[#allocation10 + $0xafc] ss:$52 sps:$4 sm:$0xff]   ;;  %v5536_v24 = vld [vmem:[#allocation10 + $0xb00] ss:$52 sps:$4 sm:$0xff]  }
 0x297   :  { %v1267_v30 = vsel %vm1251_vm6, %v5108_v8, %v4643_v27  ;;  %v6332_v15 = vpack.c.bf16 %v1266_v14, %v1266_v14  ;;  %v5521_v8 = vld [vmem:[#allocation10 + $0xa28] ss:$52 sps:$4 sm:$0xff]   ;;  %v5539_v26 = vld [vmem:[#allocation10 + $0xb60] ss:$52 sps:$4 sm:$0xff]  }
 0x298   :  { %v6330_v31 = vpack.c.bf16 %v1267_v30, %v1267_v30  ;;  %v1269_v32 = vsel %vm1253_vm7, %v5110_v9, %v4645_v28  ;;  %v5524_v9 = vld [vmem:[#allocation10 + $0xa30] ss:$52 sps:$4 sm:$0xff]   ;;  %v5109_v10 = vadd.f32 %v6328_v4, %v437_v5  ;;  %v5542_v27 = vld [vmem:[#allocation10 + $0xb68] ss:$52 sps:$4 sm:$0xff]   ;;  %v5547_v14 = vld [vmem:[#allocation10 + $0xbcc] ss:$52 sps:$4 sm:$0xff]  }
 0x299   :  { %v6336_v37 = vpack.c.bf16 %v1269_v32, %v1269_v32  ;;  %v5541_v4 = vld [vmem:[#allocation10 + $0xb64] ss:$52 sps:$4 sm:$0xff]   ;;  %v5550_v28 = vld [vmem:[#allocation10 + $0xbd4] ss:$52 sps:$4 sm:$0xff]  }
 0x29a   :  { %2096 = vmatprep.mubr.bf16.mxu0 %v6330_v31  ;;  %2178 = vmatprep.mubr.bf16.mxu1 %v6330_v31  ;;  %v1258_v21 = vmul.f32 1.442695, %v5109_v10  ;;  %v5545_v30 = vld [vmem:[#allocation10 + $0xbc8] ss:$52 sps:$4 sm:$0xff]   ;;  %v5548_v32 = vld [vmem:[#allocation10 + $0xbd0] ss:$52 sps:$4 sm:$0xff]  }
 0x29b   :  { %2097 = vmatmul.mubr.bf16.vlgmr.msra.gmra.mrb[8].mxu0 %v6332_v15  ;;  %2179 = vmatmul.mubr.bf16.vlgmr.msra.gmra.mrb[8].mxu1 %v6332_v15  ;;  %vm1252_vm8 = vcmp.gt.f32.partialorder %v5109_v10, 0.0  ;;  %v5593_v5 = vld [vmem:[#allocation10 + $0x218] ss:$52 sps:$4 sm:$0xff]  }
 0x29c   :  { %2106 = vmatpush1.bf16.msra.mxu0 %v5467_v33  ;;  %2188 = vmatpush1.bf16.msra.mxu1 %v5470_v34  ;;  %5993 = vpow2.f32 %v1258_v21  ;;  %v5553_v33 = vld [vmem:[#allocation10 + $0xc34] ss:$52 sps:$4 sm:$0xff]   ;;  %v5556_v34 = vld [vmem:[#allocation10 + $0xc3c] ss:$52 sps:$4 sm:$0xff]  }
 0x29d   :  { %2137 = vmatprep.mubr.bf16.mxu0 %v6336_v37  ;;  %2219 = vmatprep.mubr.bf16.mxu1 %v6336_v37  ;;  %v5613_v21 = vld [vmem:[#allocation10 + $0x354] ss:$52 sps:$4 sm:$0xff]  }
 0x29e   :  { %2107 = vmatprep.subr.bf16.mxu0 %v5475_v35  ;;  %2189 = vmatprep.subr.bf16.mxu1 %v5478_v36  ;;  %v5551_v36 = vld [vmem:[#allocation10 + $0xc30] ss:$52 sps:$4 sm:$0xff]  }
 0x2a0   :  { %2108 = vmatpush1.bf16.msra.mxu0 %v5473_v29  ;;  %2190 = vmatpush1.bf16.msra.mxu1 %v5476_v38  ;;  %v5554_v29 = vld [vmem:[#allocation10 + $0xc38] ss:$52 sps:$4 sm:$0xff]   ;;  %v5559_v38 = vld [vmem:[#allocation10 + $0xc9c] ss:$52 sps:$4 sm:$0xff]  }
 0x2a1   :  { %2109 = vmatprep.subr.bf16.mxu0 %v5481_v39  ;;  %2191 = vmatprep.subr.bf16.mxu1 %v5484_v40  ;;  %v5562_v39 = vld [vmem:[#allocation10 + $0xca4] ss:$52 sps:$4 sm:$0xff]  }
 0x2a4   :  { %2110 = vmatpush1.bf16.msra.mxu0 %v5479_v41  ;;  %2192 = vmatpush1.bf16.msra.mxu1 %v5482_v42  ;;  %v5557_v41 = vld [vmem:[#allocation10 + $0xc98] ss:$52 sps:$4 sm:$0xff]   ;;  %v5560_v42 = vld [vmem:[#allocation10 + $0xca0] ss:$52 sps:$4 sm:$0xff]  }
 0x2a5   :  { %2111 = vmatprep.subr.bf16.mxu0 %v5487_v43  ;;  %2193 = vmatprep.subr.bf16.mxu1 %v5490_v44  ;;  %v5565_v43 = vld [vmem:[#allocation10 + $0x14] ss:$52 sps:$4 sm:$0xff]   ;;  %v5568_v44 = vld [vmem:[#allocation10 + $0x1c] ss:$52 sps:$4 sm:$0xff]  }
 0x2a6   :  { %v5994_v35 = vpop.eup %5993 }
 0x2a7   :  { %v4644_v40 = vadd.f32 -1.0, %v5994_v35  ;;  %v5632_v35 = vld [vmem:[#allocation10 + $0x490] ss:$52 sps:$4 sm:$0xff]  }
 0x2a8   :  { %2112 = vmatpush1.bf16.msra.mxu0 %v5485_v45  ;;  %2194 = vmatpush1.bf16.msra.mxu1 %v5488_v46  ;;  %v5563_v46 = vld [vmem:[#allocation10 + $0x10] ss:$52 sps:$4 sm:$0xff]  }
 0x2a9   :  { %2113 = vmatprep.subr.bf16.mxu0 %v5493_v47  ;;  %2195 = vmatprep.subr.bf16.mxu1 %v5496_v48  ;;  %v1268_v45 = vsel %vm1252_vm8, %v5109_v10, %v4644_v40  ;;  %v5566_v48 = vld [vmem:[#allocation10 + $0x18] ss:$52 sps:$4 sm:$0xff]   ;;  %v5602_v10 = vld [vmem:[#allocation10 + $0x288] ss:$52 sps:$4 sm:$0xff]  }
 0x2aa   :  { %v6345_v47 = vpack.c.bf16 %v1268_v45, %v1268_v45  ;;  %v5643_v40 = vld [vmem:[#allocation10 + $0x55c] ss:$52 sps:$4 sm:$0xff]   ;;  %v5652_v45 = vld [vmem:[#allocation10 + $0x5cc] ss:$52 sps:$4 sm:$0xff]  }
 0x2ac   :  { %2114 = vmatpush1.bf16.msra.mxu0 %v5491_v49  ;;  %2196 = vmatpush1.bf16.msra.mxu1 %v5494_v50  ;;  %v5571_v49 = vld [vmem:[#allocation10 + $0x7c] ss:$52 sps:$4 sm:$0xff]   ;;  %v5574_v50 = vld [vmem:[#allocation10 + $0x84] ss:$52 sps:$4 sm:$0xff]  }
 0x2ad   :  { %2115 = vmatprep.subr.bf16.mxu0 %v5499_v51  ;;  %2197 = vmatprep.subr.bf16.mxu1 %v5502_v52  ;;  %v5569_v51 = vld [vmem:[#allocation10 + $0x78] ss:$52 sps:$4 sm:$0xff]   ;;  %v5572_v52 = vld [vmem:[#allocation10 + $0x80] ss:$52 sps:$4 sm:$0xff]  }
 0x2b0   :  { %2116 = vmatpush1.bf16.msra.mxu0 %v5497_v53  ;;  %2198 = vmatpush1.bf16.msra.mxu1 %v5500_v54  ;;  %v5577_v53 = vld [vmem:[#allocation10 + $0xe4] ss:$52 sps:$4 sm:$0xff]   ;;  %v5580_v54 = vld [vmem:[#allocation10 + $0xec] ss:$52 sps:$4 sm:$0xff]  }
 0x2b1   :  { %2117 = vmatprep.subr.bf16.mxu0 %v5505_v55  ;;  %2199 = vmatprep.subr.bf16.mxu1 %v5508_v56  ;;  %v5575_v55 = vld [vmem:[#allocation10 + $0xe0] ss:$52 sps:$4 sm:$0xff]   ;;  %v5578_v56 = vld [vmem:[#allocation10 + $0xe8] ss:$52 sps:$4 sm:$0xff]  }
 0x2b4   :  { %2118 = vmatpush1.bf16.msra.mxu0 %v5503_v57  ;;  %2200 = vmatpush1.bf16.msra.mxu1 %v5506_v58  ;;  %v5583_v57 = vld [vmem:[#allocation10 + $0x14c] ss:$52 sps:$4 sm:$0xff]   ;;  %v5586_v58 = vld [vmem:[#allocation10 + $0x154] ss:$52 sps:$4 sm:$0xff]  }
 0x2b5   :  { %2119 = vmatprep.subr.bf16.mxu0 %v5511_v59  ;;  %2201 = vmatprep.subr.bf16.mxu1 %v5514_v60  ;;  %v5581_v59 = vld [vmem:[#allocation10 + $0x148] ss:$52 sps:$4 sm:$0xff]   ;;  %v5584_v60 = vld [vmem:[#allocation10 + $0x150] ss:$52 sps:$4 sm:$0xff]  }
 0x2b8   :  { %2120 = vmatpush1.bf16.msra.mxu0 %v5509_v61  ;;  %2202 = vmatpush1.bf16.msra.mxu1 %v5512_v62  ;;  %v5589_v61 = vld [vmem:[#allocation10 + $0x1b4] ss:$52 sps:$4 sm:$0xff]   ;;  %v5592_v62 = vld [vmem:[#allocation10 + $0x1bc] ss:$52 sps:$4 sm:$0xff]  }
 0x2b9   :  { %2121 = vmatprep.subr.bf16.mxu0 %v5517_v0  ;;  %2203 = vmatprep.subr.bf16.mxu1 %v5520_v1  ;;  %v5587_v0 = vld [vmem:[#allocation10 + $0x1b0] ss:$52 sps:$4 sm:$0xff]   ;;  %v5590_v1 = vld [vmem:[#allocation10 + $0x1b8] ss:$52 sps:$4 sm:$0xff]  }
 0x2bc   :  { %2122 = vmatpush1.bf16.msra.mxu0 %v5515_v2  ;;  %2204 = vmatpush1.bf16.msra.mxu1 %v5518_v3  ;;  %v5595_v2 = vld [vmem:[#allocation10 + $0x21c] ss:$52 sps:$4 sm:$0xff]   ;;  %v5598_v3 = vld [vmem:[#allocation10 + $0x224] ss:$52 sps:$4 sm:$0xff]  }
 0x2bd   :  { %2123 = vmatprep.subr.bf16.mxu0 %v5523_v6  ;;  %2205 = vmatprep.subr.bf16.mxu1 %v5526_v7  ;;  %v5596_v6 = vld [vmem:[#allocation10 + $0x220] ss:$52 sps:$4 sm:$0xff]   ;;  %v5601_v7 = vld [vmem:[#allocation10 + $0x284] ss:$52 sps:$4 sm:$0xff]  }
 0x2c0   :  { %2124 = vmatpush1.bf16.msra.mxu0 %v5521_v8  ;;  %2206 = vmatpush1.bf16.msra.mxu1 %v5524_v9  ;;  %v5604_v8 = vld [vmem:[#allocation10 + $0x28c] ss:$52 sps:$4 sm:$0xff]  }
 0x2c1   :  { %2125 = vmatprep.subr.bf16.mxu0 %v5529_v11  ;;  %2207 = vmatprep.subr.bf16.mxu1 %v5532_v12  ;;  %v5599_v9 = vld [vmem:[#allocation10 + $0x280] ss:$52 sps:$4 sm:$0xff]  }
 0x2c2   :  { %v5607_v11 = vld [vmem:[#allocation10 + $0x2ec] ss:$52 sps:$4 sm:$0xff]   ;;  %v5610_v12 = vld [vmem:[#allocation10 + $0x2f4] ss:$52 sps:$4 sm:$0xff]  }
 0x2c4   :  { %2126 = vmatpush1.bf16.msra.mxu0 %v5527_v13  ;;  %2208 = vmatpush1.bf16.msra.mxu1 %v5530_v20  ;;  %v5605_v13 = vld [vmem:[#allocation10 + $0x2e8] ss:$52 sps:$4 sm:$0xff]   ;;  %v5608_v20 = vld [vmem:[#allocation10 + $0x2f0] ss:$52 sps:$4 sm:$0xff]  }
 0x2c5   :  { %2127 = vmatprep.subr.bf16.mxu0 %v5535_v63  ;;  %2209 = vmatprep.subr.bf16.mxu1 %v5538_v22  ;;  %v5616_v63 = vld [vmem:[#allocation10 + $0x35c] ss:$52 sps:$4 sm:$0xff]  }
 0x2c6   :  { %v5611_v22 = vld [vmem:[#allocation10 + $0x350] ss:$52 sps:$4 sm:$0xff]  }
 0x2c8   :  { %2128 = vmatpush1.bf16.msra.mxu0 %v5533_v23  ;;  %2210 = vmatpush1.bf16.msra.mxu1 %v5536_v24  ;;  %v5614_v23 = vld [vmem:[#allocation10 + $0x358] ss:$52 sps:$4 sm:$0xff]   ;;  %v5619_v24 = vld [vmem:[#allocation10 + $0x3bc] ss:$52 sps:$4 sm:$0xff]  }
 0x2c9   :  { %2129 = vmatprep.subr.bf16.mxu0 %v5541_v4  ;;  %2211 = vmatprep.subr.bf16.mxu1 %v5544_v25  ;;  %v5622_v4 = vld [vmem:[#allocation10 + $0x3c4] ss:$52 sps:$4 sm:$0xff]  }
 0x2ca   :  { %v5617_v25 = vld [vmem:[#allocation10 + $0x3b8] ss:$52 sps:$4 sm:$0xff]  }
 0x2cc   :  { %2130 = vmatpush1.bf16.msra.mxu0 %v5539_v26  ;;  %2212 = vmatpush1.bf16.msra.mxu1 %v5542_v27  ;;  %v5620_v26 = vld [vmem:[#allocation10 + $0x3c0] ss:$52 sps:$4 sm:$0xff]   ;;  %v5625_v27 = vld [vmem:[#allocation10 + $0x424] ss:$52 sps:$4 sm:$0xff]  }
 0x2cd   :  { %2131 = vmatprep.subr.bf16.mxu0 %v5547_v14  ;;  %2213 = vmatprep.subr.bf16.mxu1 %v5550_v28  ;;  %v5628_v14 = vld [vmem:[#allocation10 + $0x42c] ss:$52 sps:$4 sm:$0xff]  }
 0x2ce   :  { %v5623_v28 = vld [vmem:[#allocation10 + $0x420] ss:$52 sps:$4 sm:$0xff]  }
 0x2d0   :  { %2132 = vmatpush1.bf16.msra.mxu0 %v5545_v30  ;;  %2214 = vmatpush1.bf16.msra.mxu1 %v5548_v32  ;;  %v5626_v30 = vld [vmem:[#allocation10 + $0x428] ss:$52 sps:$4 sm:$0xff]   ;;  %v5631_v32 = vld [vmem:[#allocation10 + $0x48c] ss:$52 sps:$4 sm:$0xff]  }
 0x2d1   :  { %2133 = vmatprep.subr.bf16.mxu0 %v5553_v33  ;;  %2215 = vmatprep.subr.bf16.mxu1 %v5556_v34  ;;  %v5634_v33 = vld [vmem:[#allocation10 + $0x494] ss:$52 sps:$4 sm:$0xff]  }
 0x2d2   :  { %v5629_v34 = vld [vmem:[#allocation10 + $0x488] ss:$52 sps:$4 sm:$0xff]  }
 0x2d4   :  { %2134 = vmatpush1.bf16.msra.mxu0 %v5551_v36  ;;  %2216 = vmatpush1.bf16.msra.mxu1 %v5554_v29  ;;  %v5637_v36 = vld [vmem:[#allocation10 + $0x4f4] ss:$52 sps:$4 sm:$0xff]   ;;  %v5640_v29 = vld [vmem:[#allocation10 + $0x4fc] ss:$52 sps:$4 sm:$0xff]  }
 0x2d5   :  { %2135 = vmatprep.subr.bf16.mxu0 %v5559_v38  ;;  %2217 = vmatprep.subr.bf16.mxu1 %v5562_v39  ;;  %v5635_v38 = vld [vmem:[#allocation10 + $0x4f0] ss:$52 sps:$4 sm:$0xff]   ;;  %v5638_v39 = vld [vmem:[#allocation10 + $0x4f8] ss:$52 sps:$4 sm:$0xff]  }
 0x2d8   :  { %2136 = vmatpush1.bf16.msra.mxu0 %v5557_v41  ;;  %2218 = vmatpush1.bf16.msra.mxu1 %v5560_v42  ;;  %v5646_v41 = vld [vmem:[#allocation10 + $0x564] ss:$52 sps:$4 sm:$0xff]  }
 0x2d9   :  { %3022 = vmatprep.subr.bf16.mxu0 %v5565_v43  ;;  %3104 = vmatprep.subr.bf16.mxu1 %v5568_v44  ;;  %v5641_v42 = vld [vmem:[#allocation10 + $0x558] ss:$52 sps:$4 sm:$0xff]   ;;  %v5644_v43 = vld [vmem:[#allocation10 + $0x560] ss:$52 sps:$4 sm:$0xff]  }
 0x2da   :  { %v5649_v44 = vld [vmem:[#allocation10 + $0x5c4] ss:$52 sps:$4 sm:$0xff]  }
 0x2db   :  { %2138 = vmatmul.mubr.bf16.vlgmr.msra.gmra.mrb[8].mxu0 %v6345_v47  ;;  %2220 = vmatmul.mubr.bf16.vlgmr.msra.gmra.mrb[8].mxu1 %v6345_v47 }
 0x2dc   :  { %3023 = vmatpush1.bf16.msra.mxu0 %v5563_v46  ;;  %3054 = vmatprep.mubr.bf16.mxu0 %v6330_v31  ;;  %v5647_v46 = vld [vmem:[#allocation10 + $0x5c0] ss:$52 sps:$4 sm:$0xff]  }
 0x2dd   :  { %3105 = vmatpush1.bf16.msra.mxu1 %v5566_v48  ;;  %3136 = vmatprep.mubr.bf16.mxu1 %v6330_v31  ;;  %v5650_v48 = vld [vmem:[#allocation10 + $0x5c8] ss:$52 sps:$4 sm:$0xff]  }
 0x2de   :  { %3024 = vmatprep.subr.bf16.mxu0 %v5571_v49  ;;  %3106 = vmatprep.subr.bf16.mxu1 %v5574_v50  ;;  %v5655_v49 = vld [vmem:[#allocation10 + $0x62c] ss:$52 sps:$4 sm:$0xff]   ;;  %v5658_v50 = vld [vmem:[#allocation10 + $0x634] ss:$52 sps:$4 sm:$0xff]  }
 0x2e0   :  { %3025 = vmatpush1.bf16.msra.mxu0 %v5569_v51  ;;  %v5653_v51 = vld [vmem:[#allocation10 + $0x628] ss:$52 sps:$4 sm:$0xff]  }
 0x2e1   :  { %3107 = vmatpush1.bf16.msra.mxu1 %v5572_v52  ;;  %3026 = vmatprep.subr.bf16.mxu0 %v5577_v53  ;;  %v5656_v52 = vld [vmem:[#allocation10 + $0x630] ss:$52 sps:$4 sm:$0xff]   ;;  %v5661_v53 = vld [vmem:[#allocation10 + $0x694] ss:$52 sps:$4 sm:$0xff]  }
 0x2e2   :  { %3108 = vmatprep.subr.bf16.mxu1 %v5580_v54  ;;  %v5664_v54 = vld [vmem:[#allocation10 + $0x69c] ss:$52 sps:$4 sm:$0xff]  }
 0x2e4   :  { %3027 = vmatpush1.bf16.msra.mxu0 %v5575_v55  ;;  %v5659_v55 = vld [vmem:[#allocation10 + $0x690] ss:$52 sps:$4 sm:$0xff]  }
 0x2e5   :  { %3109 = vmatpush1.bf16.msra.mxu1 %v5578_v56  ;;  %3028 = vmatprep.subr.bf16.mxu0 %v5583_v57  ;;  %v5662_v56 = vld [vmem:[#allocation10 + $0x698] ss:$52 sps:$4 sm:$0xff]   ;;  %v5667_v57 = vld [vmem:[#allocation10 + $0x6fc] ss:$52 sps:$4 sm:$0xff]  }
 0x2e6   :  { %3110 = vmatprep.subr.bf16.mxu1 %v5586_v58  ;;  %v5670_v58 = vld [vmem:[#allocation10 + $0x704] ss:$52 sps:$4 sm:$0xff]  }
 0x2e8   :  { %3029 = vmatpush1.bf16.msra.mxu0 %v5581_v59  ;;  %v5665_v59 = vld [vmem:[#allocation10 + $0x6f8] ss:$52 sps:$4 sm:$0xff]  }
 0x2e9   :  { %3111 = vmatpush1.bf16.msra.mxu1 %v5584_v60  ;;  %3030 = vmatprep.subr.bf16.mxu0 %v5589_v61  ;;  %v5668_v60 = vld [vmem:[#allocation10 + $0x700] ss:$52 sps:$4 sm:$0xff]   ;;  %v5673_v61 = vld [vmem:[#allocation10 + $0x764] ss:$52 sps:$4 sm:$0xff]  }
 0x2ea   :  { %3112 = vmatprep.subr.bf16.mxu1 %v5592_v62  ;;  %v5676_v62 = vld [vmem:[#allocation10 + $0x76c] ss:$52 sps:$4 sm:$0xff]  }
 0x2ec   :  { %3031 = vmatpush1.bf16.msra.mxu0 %v5587_v0  ;;  %v5671_v0 = vld [vmem:[#allocation10 + $0x760] ss:$52 sps:$4 sm:$0xff]  }
 0x2ed   :  { %3113 = vmatpush1.bf16.msra.mxu1 %v5590_v1  ;;  %3032 = vmatprep.subr.bf16.mxu0 %v5595_v2  ;;  %v5674_v1 = vld [vmem:[#allocation10 + $0x768] ss:$52 sps:$4 sm:$0xff]   ;;  %v5679_v2 = vld [vmem:[#allocation10 + $0x7cc] ss:$52 sps:$4 sm:$0xff]  }
 0x2ee   :  { %3114 = vmatprep.subr.bf16.mxu1 %v5598_v3  ;;  %v5682_v3 = vld [vmem:[#allocation10 + $0x7d4] ss:$52 sps:$4 sm:$0xff]  }
 0x2f0   :  { %3033 = vmatpush1.bf16.msra.mxu0 %v5593_v5  ;;  %v5677_v5 = vld [vmem:[#allocation10 + $0x7c8] ss:$52 sps:$4 sm:$0xff]  }
 0x2f1   :  { %3115 = vmatpush1.bf16.msra.mxu1 %v5596_v6  ;;  %3034 = vmatprep.subr.bf16.mxu0 %v5601_v7  ;;  %v5680_v6 = vld [vmem:[#allocation10 + $0x7d0] ss:$52 sps:$4 sm:$0xff]   ;;  %v5685_v7 = vld [vmem:[#allocation10 + $0x834] ss:$52 sps:$4 sm:$0xff]  }
 0x2f2   :  { %3116 = vmatprep.subr.bf16.mxu1 %v5604_v8  ;;  %v5688_v8 = vld [vmem:[#allocation10 + $0x83c] ss:$52 sps:$4 sm:$0xff]  }
 0x2f4   :  { %3035 = vmatpush1.bf16.msra.mxu0 %v5599_v9  ;;  %v5683_v9 = vld [vmem:[#allocation10 + $0x830] ss:$52 sps:$4 sm:$0xff]  }
 0x2f5   :  { %3117 = vmatpush1.bf16.msra.mxu1 %v5602_v10  ;;  %3036 = vmatprep.subr.bf16.mxu0 %v5607_v11  ;;  %v5686_v10 = vld [vmem:[#allocation10 + $0x838] ss:$52 sps:$4 sm:$0xff]   ;;  %v5691_v11 = vld [vmem:[#allocation10 + $0x89c] ss:$52 sps:$4 sm:$0xff]  }
 0x2f6   :  { %3118 = vmatprep.subr.bf16.mxu1 %v5610_v12  ;;  %v5694_v12 = vld [vmem:[#allocation10 + $0x8a4] ss:$52 sps:$4 sm:$0xff]  }
 0x2f8   :  { %3037 = vmatpush1.bf16.msra.mxu0 %v5605_v13  ;;  %v5689_v13 = vld [vmem:[#allocation10 + $0x898] ss:$52 sps:$4 sm:$0xff]  }
 0x2f9   :  { %3119 = vmatpush1.bf16.msra.mxu1 %v5608_v20  ;;  %3038 = vmatprep.subr.bf16.mxu0 %v5613_v21  ;;  %v5692_v20 = vld [vmem:[#allocation10 + $0x8a0] ss:$52 sps:$4 sm:$0xff]   ;;  %v5697_v21 = vld [vmem:[#allocation10 + $0x904] ss:$52 sps:$4 sm:$0xff]  }
 0x2fa   :  { %3120 = vmatprep.subr.bf16.mxu1 %v5616_v63  ;;  %v5700_v63 = vld [vmem:[#allocation10 + $0x90c] ss:$52 sps:$4 sm:$0xff]  }
 0x2fc   :  { %3039 = vmatpush1.bf16.msra.mxu0 %v5611_v22  ;;  %v5695_v22 = vld [vmem:[#allocation10 + $0x900] ss:$52 sps:$4 sm:$0xff]  }
 0x2fd   :  { %3121 = vmatpush1.bf16.msra.mxu1 %v5614_v23  ;;  %3040 = vmatprep.subr.bf16.mxu0 %v5619_v24  ;;  %v5698_v23 = vld [vmem:[#allocation10 + $0x908] ss:$52 sps:$4 sm:$0xff]   ;;  %v5703_v24 = vld [vmem:[#allocation10 + $0x96c] ss:$52 sps:$4 sm:$0xff]  }
 0x2fe   :  { %3122 = vmatprep.subr.bf16.mxu1 %v5622_v4  ;;  %v5706_v4 = vld [vmem:[#allocation10 + $0x974] ss:$52 sps:$4 sm:$0xff]  }
 0x300   :  { %3041 = vmatpush1.bf16.msra.mxu0 %v5617_v25  ;;  %v5701_v25 = vld [vmem:[#allocation10 + $0x968] ss:$52 sps:$4 sm:$0xff]  }
 0x301   :  { %3123 = vmatpush1.bf16.msra.mxu1 %v5620_v26  ;;  %3042 = vmatprep.subr.bf16.mxu0 %v5625_v27  ;;  %v5704_v26 = vld [vmem:[#allocation10 + $0x970] ss:$52 sps:$4 sm:$0xff]   ;;  %v5709_v27 = vld [vmem:[#allocation10 + $0x9d4] ss:$52 sps:$4 sm:$0xff]  }
 0x302   :  { %3124 = vmatprep.subr.bf16.mxu1 %v5628_v14  ;;  %v5712_v14 = vld [vmem:[#allocation10 + $0x9dc] ss:$52 sps:$4 sm:$0xff]  }
 0x304   :  { %3043 = vmatpush1.bf16.msra.mxu0 %v5623_v28  ;;  %v5707_v28 = vld [vmem:[#allocation10 + $0x9d0] ss:$52 sps:$4 sm:$0xff]  }
 0x305   :  { %3125 = vmatpush1.bf16.msra.mxu1 %v5626_v30  ;;  %3044 = vmatprep.subr.bf16.mxu0 %v5631_v32  ;;  %v5710_v30 = vld [vmem:[#allocation10 + $0x9d8] ss:$52 sps:$4 sm:$0xff]   ;;  %v5715_v32 = vld [vmem:[#allocation10 + $0xa3c] ss:$52 sps:$4 sm:$0xff]  }
 0x306   :  { %3126 = vmatprep.subr.bf16.mxu1 %v5634_v33  ;;  %v5718_v33 = vld [vmem:[#allocation10 + $0xa44] ss:$52 sps:$4 sm:$0xff]  }
 0x308   :  { %3045 = vmatpush1.bf16.msra.mxu0 %v5629_v34  ;;  %v5713_v34 = vld [vmem:[#allocation10 + $0xa38] ss:$52 sps:$4 sm:$0xff]  }
 0x309   :  { %3127 = vmatpush1.bf16.msra.mxu1 %v5632_v35  ;;  %3046 = vmatprep.subr.bf16.mxu0 %v5637_v36  ;;  %v5716_v35 = vld [vmem:[#allocation10 + $0xa40] ss:$52 sps:$4 sm:$0xff]   ;;  %v5721_v36 = vld [vmem:[#allocation10 + $0xaa4] ss:$52 sps:$4 sm:$0xff]  }
 0x30a   :  { %3128 = vmatprep.subr.bf16.mxu1 %v5640_v29  ;;  %v5724_v29 = vld [vmem:[#allocation10 + $0xaac] ss:$52 sps:$4 sm:$0xff]  }
 0x30c   :  { %3047 = vmatpush1.bf16.msra.mxu0 %v5635_v38  ;;  %v5719_v38 = vld [vmem:[#allocation10 + $0xaa0] ss:$52 sps:$4 sm:$0xff]  }
 0x30d   :  { %3129 = vmatpush1.bf16.msra.mxu1 %v5638_v39  ;;  %3048 = vmatprep.subr.bf16.mxu0 %v5643_v40  ;;  %v5722_v39 = vld [vmem:[#allocation10 + $0xaa8] ss:$52 sps:$4 sm:$0xff]   ;;  %v5727_v40 = vld [vmem:[#allocation10 + $0xb0c] ss:$52 sps:$4 sm:$0xff]  }
 0x30e   :  { %3130 = vmatprep.subr.bf16.mxu1 %v5646_v41  ;;  %v5730_v41 = vld [vmem:[#allocation10 + $0xb14] ss:$52 sps:$4 sm:$0xff]  }
 0x310   :  { %3049 = vmatpush1.bf16.msra.mxu0 %v5641_v42  ;;  %v5725_v42 = vld [vmem:[#allocation10 + $0xb08] ss:$52 sps:$4 sm:$0xff]  }
 0x311   :  { %3131 = vmatpush1.bf16.msra.mxu1 %v5644_v43  ;;  %3050 = vmatprep.subr.bf16.mxu0 %v5649_v44  ;;  %v5728_v43 = vld [vmem:[#allocation10 + $0xb10] ss:$52 sps:$4 sm:$0xff]   ;;  %v5733_v44 = vld [vmem:[#allocation10 + $0xb74] ss:$52 sps:$4 sm:$0xff]  }
 0x312   :  { %3132 = vmatprep.subr.bf16.mxu1 %v5652_v45  ;;  %v5736_v45 = vld [vmem:[#allocation10 + $0xb7c] ss:$52 sps:$4 sm:$0xff]  }
 0x314   :  { %3051 = vmatpush1.bf16.msra.mxu0 %v5647_v46  ;;  %v5731_v46 = vld [vmem:[#allocation10 + $0xb70] ss:$52 sps:$4 sm:$0xff]  }
 0x315   :  { %3133 = vmatpush1.bf16.msra.mxu1 %v5650_v48  ;;  %3052 = vmatprep.subr.bf16.mxu0 %v5655_v49  ;;  %v5734_v48 = vld [vmem:[#allocation10 + $0xb78] ss:$52 sps:$4 sm:$0xff]   ;;  %v5739_v49 = vld [vmem:[#allocation10 + $0xbdc] ss:$52 sps:$4 sm:$0xff]  }
 0x316   :  { %3134 = vmatprep.subr.bf16.mxu1 %v5658_v50  ;;  %v5742_v50 = vld [vmem:[#allocation10 + $0xbe4] ss:$52 sps:$4 sm:$0xff]  }
 0x318   :  { %3053 = vmatpush1.bf16.msra.mxu0 %v5653_v51  ;;  %v5737_v51 = vld [vmem:[#allocation10 + $0xbd8] ss:$52 sps:$4 sm:$0xff]  }
 0x319   :  { %3135 = vmatpush1.bf16.msra.mxu1 %v5656_v52  ;;  %3063 = vmatprep.subr.bf16.mxu0 %v5661_v53  ;;  %v5740_v52 = vld [vmem:[#allocation10 + $0xbe0] ss:$52 sps:$4 sm:$0xff]   ;;  %v5745_v53 = vld [vmem:[#allocation10 + $0xc44] ss:$52 sps:$4 sm:$0xff]  }
 0x31a   :  { %3145 = vmatprep.subr.bf16.mxu1 %v5664_v54  ;;  %v5748_v54 = vld [vmem:[#allocation10 + $0xc4c] ss:$52 sps:$4 sm:$0xff]  }
 0x31b   :  { %3055 = vmatmul.mubr.bf16.vlgmr.msra.gmra.mrb[12].mxu0 %v6332_v15 }
 0x31c   :  { %3137 = vmatmul.mubr.bf16.vlgmr.msra.gmra.mrb[12].mxu1 %v6332_v15  ;;  %3064 = vmatpush1.bf16.msra.mxu0 %v5659_v55  ;;  %v5743_v55 = vld [vmem:[#allocation10 + $0xc40] ss:$52 sps:$4 sm:$0xff]  }
 0x31d   :  { %3095 = vmatprep.mubr.bf16.mxu0 %v6336_v37  ;;  %3146 = vmatpush1.bf16.msra.mxu1 %v5662_v56  ;;  %v5746_v56 = vld [vmem:[#allocation10 + $0xc48] ss:$52 sps:$4 sm:$0xff]  }
 0x31e   :  { %3177 = vmatprep.mubr.bf16.mxu1 %v6336_v37  ;;  %3065 = vmatprep.subr.bf16.mxu0 %v5667_v57  ;;  %v5751_v57 = vld [vmem:[#allocation10 + $0xcac] ss:$52 sps:$4 sm:$0xff]  }
 0x31f   :  { %3147 = vmatprep.subr.bf16.mxu1 %v5670_v58  ;;  %v5754_v58 = vld [vmem:[#allocation10 + $0xcb4] ss:$52 sps:$4 sm:$0xff]  }
 0x320   :  { %3066 = vmatpush1.bf16.msra.mxu0 %v5665_v59  ;;  %v5749_v59 = vld [vmem:[#allocation10 + $0xca8] ss:$52 sps:$4 sm:$0xff]  }
 0x321   :  { %3148 = vmatpush1.bf16.msra.mxu1 %v5668_v60  ;;  %3067 = vmatprep.subr.bf16.mxu0 %v5673_v61  ;;  %v5752_v60 = vld [vmem:[#allocation10 + $0xcb0] ss:$52 sps:$4 sm:$0xff]  }
 0x322   :  { %3149 = vmatprep.subr.bf16.mxu1 %v5676_v62  ;;  %v5757_v61 = vld [vmem:[#allocation10 + $0x24] ss:$52 sps:$4 sm:$0xff]   ;;  %v5760_v62 = vld [vmem:[#allocation10 + $0x2c] ss:$52 sps:$4 sm:$0xff]  }
 0x324   :  { %3068 = vmatpush1.bf16.msra.mxu0 %v5671_v0  ;;  %v5755_v0 = vld [vmem:[#allocation10 + $0x20] ss:$52 sps:$4 sm:$0xff]  }
 0x325   :  { %3150 = vmatpush1.bf16.msra.mxu1 %v5674_v1  ;;  %3069 = vmatprep.subr.bf16.mxu0 %v5679_v2  ;;  %v5758_v1 = vld [vmem:[#allocation10 + $0x28] ss:$52 sps:$4 sm:$0xff]   ;;  %v5763_v2 = vld [vmem:[#allocation10 + $0x8c] ss:$52 sps:$4 sm:$0xff]  }
 0x326   :  { %3151 = vmatprep.subr.bf16.mxu1 %v5682_v3  ;;  %v5766_v3 = vld [vmem:[#allocation10 + $0x94] ss:$52 sps:$4 sm:$0xff]  }
 0x328   :  { %3070 = vmatpush1.bf16.msra.mxu0 %v5677_v5  ;;  %v5761_v5 = vld [vmem:[#allocation10 + $0x88] ss:$52 sps:$4 sm:$0xff]  }
 0x329   :  { %3152 = vmatpush1.bf16.msra.mxu1 %v5680_v6  ;;  %3071 = vmatprep.subr.bf16.mxu0 %v5685_v7  ;;  %v5764_v6 = vld [vmem:[#allocation10 + $0x90] ss:$52 sps:$4 sm:$0xff]   ;;  %v5769_v7 = vld [vmem:[#allocation10 + $0xf4] ss:$52 sps:$4 sm:$0xff]  }
 0x32a   :  { %3153 = vmatprep.subr.bf16.mxu1 %v5688_v8  ;;  %v5772_v8 = vld [vmem:[#allocation10 + $0xfc] ss:$52 sps:$4 sm:$0xff]  }
 0x32c   :  { %3072 = vmatpush1.bf16.msra.mxu0 %v5683_v9  ;;  %v5767_v9 = vld [vmem:[#allocation10 + $0xf0] ss:$52 sps:$4 sm:$0xff]  }
 0x32d   :  { %3154 = vmatpush1.bf16.msra.mxu1 %v5686_v10  ;;  %3073 = vmatprep.subr.bf16.mxu0 %v5691_v11  ;;  %v5770_v10 = vld [vmem:[#allocation10 + $0xf8] ss:$52 sps:$4 sm:$0xff]   ;;  %v5775_v11 = vld [vmem:[#allocation10 + $0x15c] ss:$52 sps:$4 sm:$0xff]  }
 0x32e   :  { %3155 = vmatprep.subr.bf16.mxu1 %v5694_v12  ;;  %v5778_v12 = vld [vmem:[#allocation10 + $0x164] ss:$52 sps:$4 sm:$0xff]  }
 0x330   :  { %3074 = vmatpush1.bf16.msra.mxu0 %v5689_v13  ;;  %v5773_v13 = vld [vmem:[#allocation10 + $0x158] ss:$52 sps:$4 sm:$0xff]  }
 0x331   :  { %3156 = vmatpush1.bf16.msra.mxu1 %v5692_v20  ;;  %3075 = vmatprep.subr.bf16.mxu0 %v5697_v21  ;;  %v5776_v20 = vld [vmem:[#allocation10 + $0x160] ss:$52 sps:$4 sm:$0xff]   ;;  %v5781_v21 = vld [vmem:[#allocation10 + $0x1c4] ss:$52 sps:$4 sm:$0xff]  }
 0x332   :  { %3157 = vmatprep.subr.bf16.mxu1 %v5700_v63  ;;  %v5784_v63 = vld [vmem:[#allocation10 + $0x1cc] ss:$52 sps:$4 sm:$0xff]  }
 0x334   :  { %3076 = vmatpush1.bf16.msra.mxu0 %v5695_v22  ;;  %v5779_v22 = vld [vmem:[#allocation10 + $0x1c0] ss:$52 sps:$4 sm:$0xff]  }
 0x335   :  { %3158 = vmatpush1.bf16.msra.mxu1 %v5698_v23  ;;  %3077 = vmatprep.subr.bf16.mxu0 %v5703_v24  ;;  %v5782_v23 = vld [vmem:[#allocation10 + $0x1c8] ss:$52 sps:$4 sm:$0xff]   ;;  %v5787_v24 = vld [vmem:[#allocation10 + $0x22c] ss:$52 sps:$4 sm:$0xff]  }
 0x336   :  { %3159 = vmatprep.subr.bf16.mxu1 %v5706_v4  ;;  %v5790_v4 = vld [vmem:[#allocation10 + $0x234] ss:$52 sps:$4 sm:$0xff]  }
 0x338   :  { %3078 = vmatpush1.bf16.msra.mxu0 %v5701_v25  ;;  %v5785_v25 = vld [vmem:[#allocation10 + $0x228] ss:$52 sps:$4 sm:$0xff]  }
 0x339   :  { %3160 = vmatpush1.bf16.msra.mxu1 %v5704_v26  ;;  %3079 = vmatprep.subr.bf16.mxu0 %v5709_v27  ;;  %v5788_v26 = vld [vmem:[#allocation10 + $0x230] ss:$52 sps:$4 sm:$0xff]   ;;  %v5793_v27 = vld [vmem:[#allocation10 + $0x294] ss:$52 sps:$4 sm:$0xff]  }
 0x33a   :  { %3161 = vmatprep.subr.bf16.mxu1 %v5712_v14  ;;  %v5796_v14 = vld [vmem:[#allocation10 + $0x29c] ss:$52 sps:$4 sm:$0xff]  }
 0x33c   :  { %3080 = vmatpush1.bf16.msra.mxu0 %v5707_v28  ;;  %v5791_v28 = vld [vmem:[#allocation10 + $0x290] ss:$52 sps:$4 sm:$0xff]  }
 0x33d   :  { %3162 = vmatpush1.bf16.msra.mxu1 %v5710_v30  ;;  %3081 = vmatprep.subr.bf16.mxu0 %v5715_v32  ;;  %v5794_v30 = vld [vmem:[#allocation10 + $0x298] ss:$52 sps:$4 sm:$0xff]   ;;  %v5799_v32 = vld [vmem:[#allocation10 + $0x2fc] ss:$52 sps:$4 sm:$0xff]  }
 0x33e   :  { %3163 = vmatprep.subr.bf16.mxu1 %v5718_v33  ;;  %v5802_v33 = vld [vmem:[#allocation10 + $0x304] ss:$52 sps:$4 sm:$0xff]  }
 0x340   :  { %3082 = vmatpush1.bf16.msra.mxu0 %v5713_v34  ;;  %v5797_v34 = vld [vmem:[#allocation10 + $0x2f8] ss:$52 sps:$4 sm:$0xff]  }
 0x341   :  { %3164 = vmatpush1.bf16.msra.mxu1 %v5716_v35  ;;  %3083 = vmatprep.subr.bf16.mxu0 %v5721_v36  ;;  %v5800_v35 = vld [vmem:[#allocation10 + $0x300] ss:$52 sps:$4 sm:$0xff]   ;;  %v5805_v36 = vld [vmem:[#allocation10 + $0x364] ss:$52 sps:$4 sm:$0xff]  }
 0x342   :  { %3165 = vmatprep.subr.bf16.mxu1 %v5724_v29  ;;  %v5808_v29 = vld [vmem:[#allocation10 + $0x36c] ss:$52 sps:$4 sm:$0xff]  }
 0x344   :  { %3084 = vmatpush1.bf16.msra.mxu0 %v5719_v38  ;;  %v5803_v38 = vld [vmem:[#allocation10 + $0x360] ss:$52 sps:$4 sm:$0xff]  }
 0x345   :  { %3166 = vmatpush1.bf16.msra.mxu1 %v5722_v39  ;;  %3085 = vmatprep.subr.bf16.mxu0 %v5727_v40  ;;  %v5806_v39 = vld [vmem:[#allocation10 + $0x368] ss:$52 sps:$4 sm:$0xff]   ;;  %v5811_v40 = vld [vmem:[#allocation10 + $0x3cc] ss:$52 sps:$4 sm:$0xff]  }
 0x346   :  { %3167 = vmatprep.subr.bf16.mxu1 %v5730_v41  ;;  %v5814_v41 = vld [vmem:[#allocation10 + $0x3d4] ss:$52 sps:$4 sm:$0xff]  }
 0x348   :  { %3086 = vmatpush1.bf16.msra.mxu0 %v5725_v42  ;;  %v5809_v42 = vld [vmem:[#allocation10 + $0x3c8] ss:$52 sps:$4 sm:$0xff]  }
 0x349   :  { %3168 = vmatpush1.bf16.msra.mxu1 %v5728_v43  ;;  %3087 = vmatprep.subr.bf16.mxu0 %v5733_v44  ;;  %v5812_v43 = vld [vmem:[#allocation10 + $0x3d0] ss:$52 sps:$4 sm:$0xff]   ;;  %v5817_v44 = vld [vmem:[#allocation10 + $0x434] ss:$52 sps:$4 sm:$0xff]  }
 0x34a   :  { %3169 = vmatprep.subr.bf16.mxu1 %v5736_v45  ;;  %v5820_v45 = vld [vmem:[#allocation10 + $0x43c] ss:$52 sps:$4 sm:$0xff]  }
 0x34c   :  { %3088 = vmatpush1.bf16.msra.mxu0 %v5731_v46  ;;  %v5815_v46 = vld [vmem:[#allocation10 + $0x430] ss:$52 sps:$4 sm:$0xff]  }
 0x34d   :  { %3170 = vmatpush1.bf16.msra.mxu1 %v5734_v48  ;;  %3089 = vmatprep.subr.bf16.mxu0 %v5739_v49  ;;  %v5818_v48 = vld [vmem:[#allocation10 + $0x438] ss:$52 sps:$4 sm:$0xff]   ;;  %v5823_v49 = vld [vmem:[#allocation10 + $0x49c] ss:$52 sps:$4 sm:$0xff]  }
 0x34e   :  { %3171 = vmatprep.subr.bf16.mxu1 %v5742_v50  ;;  %v5826_v50 = vld [vmem:[#allocation10 + $0x4a4] ss:$52 sps:$4 sm:$0xff]  }
 0x350   :  { %3090 = vmatpush1.bf16.msra.mxu0 %v5737_v51  ;;  %v5821_v51 = vld [vmem:[#allocation10 + $0x498] ss:$52 sps:$4 sm:$0xff]  }
 0x351   :  { %3172 = vmatpush1.bf16.msra.mxu1 %v5740_v52  ;;  %3091 = vmatprep.subr.bf16.mxu0 %v5745_v53  ;;  %v5824_v52 = vld [vmem:[#allocation10 + $0x4a0] ss:$52 sps:$4 sm:$0xff]   ;;  %v5829_v53 = vld [vmem:[#allocation10 + $0x504] ss:$52 sps:$4 sm:$0xff]  }
 0x352   :  { %3173 = vmatprep.subr.bf16.mxu1 %v5748_v54  ;;  %v5832_v54 = vld [vmem:[#allocation10 + $0x50c] ss:$52 sps:$4 sm:$0xff]  }
 0x354   :  { %3092 = vmatpush1.bf16.msra.mxu0 %v5743_v55  ;;  %v5827_v55 = vld [vmem:[#allocation10 + $0x500] ss:$52 sps:$4 sm:$0xff]  }
 0x355   :  { %3174 = vmatpush1.bf16.msra.mxu1 %v5746_v56  ;;  %3093 = vmatprep.subr.bf16.mxu0 %v5751_v57  ;;  %v5830_v56 = vld [vmem:[#allocation10 + $0x508] ss:$52 sps:$4 sm:$0xff]   ;;  %v5835_v57 = vld [vmem:[#allocation10 + $0x56c] ss:$52 sps:$4 sm:$0xff]  }
 0x356   :  { %3175 = vmatprep.subr.bf16.mxu1 %v5754_v58  ;;  %v5838_v58 = vld [vmem:[#allocation10 + $0x574] ss:$52 sps:$4 sm:$0xff]  }
 0x358   :  { %3094 = vmatpush1.bf16.msra.mxu0 %v5749_v59  ;;  %v5833_v59 = vld [vmem:[#allocation10 + $0x568] ss:$52 sps:$4 sm:$0xff]  }
 0x359   :  { %3176 = vmatpush1.bf16.msra.mxu1 %v5752_v60  ;;  %3980 = vmatprep.subr.bf16.mxu0 %v5757_v61  ;;  %v5836_v60 = vld [vmem:[#allocation10 + $0x570] ss:$52 sps:$4 sm:$0xff]   ;;  %v5841_v61 = vld [vmem:[#allocation10 + $0x5d4] ss:$52 sps:$4 sm:$0xff]  }
 0x35a   :  { %4062 = vmatprep.subr.bf16.mxu1 %v5760_v62  ;;  %v5844_v62 = vld [vmem:[#allocation10 + $0x5dc] ss:$52 sps:$4 sm:$0xff]  }
 0x35b   :  { %3096 = vmatmul.mubr.bf16.vlgmr.msra.gmra.mrb[12].mxu0 %v6345_v47 }
 0x35c   :  { %3178 = vmatmul.mubr.bf16.vlgmr.msra.gmra.mrb[12].mxu1 %v6345_v47  ;;  %3981 = vmatpush1.bf16.msra.mxu0 %v5755_v0  ;;  %v5839_v0 = vld [vmem:[#allocation10 + $0x5d0] ss:$52 sps:$4 sm:$0xff]  }
 0x35d   :  { %4012 = vmatprep.mubr.bf16.mxu0 %v6330_v31  ;;  %4063 = vmatpush1.bf16.msra.mxu1 %v5758_v1  ;;  %v5842_v1 = vld [vmem:[#allocation10 + $0x5d8] ss:$52 sps:$4 sm:$0xff]  }
 0x35e   :  { %4094 = vmatprep.mubr.bf16.mxu1 %v6330_v31  ;;  %3982 = vmatprep.subr.bf16.mxu0 %v5763_v2  ;;  %v5847_v2 = vld [vmem:[#allocation10 + $0x63c] ss:$52 sps:$4 sm:$0xff]  }
 0x35f   :  { %4064 = vmatprep.subr.bf16.mxu1 %v5766_v3  ;;  %v5850_v3 = vld [vmem:[#allocation10 + $0x644] ss:$52 sps:$4 sm:$0xff]  }
 0x360   :  { %3983 = vmatpush1.bf16.msra.mxu0 %v5761_v5  ;;  %v5845_v5 = vld [vmem:[#allocation10 + $0x638] ss:$52 sps:$4 sm:$0xff]  }
 0x361   :  { %4065 = vmatpush1.bf16.msra.mxu1 %v5764_v6  ;;  %3984 = vmatprep.subr.bf16.mxu0 %v5769_v7  ;;  %v5848_v6 = vld [vmem:[#allocation10 + $0x640] ss:$52 sps:$4 sm:$0xff]   ;;  %v5853_v7 = vld [vmem:[#allocation10 + $0x6a4] ss:$52 sps:$4 sm:$0xff]  }
 0x362   :  { %4066 = vmatprep.subr.bf16.mxu1 %v5772_v8  ;;  %v5856_v8 = vld [vmem:[#allocation10 + $0x6ac] ss:$52 sps:$4 sm:$0xff]  }
 0x364   :  { %3985 = vmatpush1.bf16.msra.mxu0 %v5767_v9  ;;  %v5851_v9 = vld [vmem:[#allocation10 + $0x6a0] ss:$52 sps:$4 sm:$0xff]  }
 0x365   :  { %4067 = vmatpush1.bf16.msra.mxu1 %v5770_v10  ;;  %3986 = vmatprep.subr.bf16.mxu0 %v5775_v11  ;;  %v5854_v10 = vld [vmem:[#allocation10 + $0x6a8] ss:$52 sps:$4 sm:$0xff]   ;;  %v5859_v11 = vld [vmem:[#allocation10 + $0x70c] ss:$52 sps:$4 sm:$0xff]  }
 0x366   :  { %4068 = vmatprep.subr.bf16.mxu1 %v5778_v12  ;;  %v5862_v12 = vld [vmem:[#allocation10 + $0x714] ss:$52 sps:$4 sm:$0xff]  }
 0x368   :  { %3987 = vmatpush1.bf16.msra.mxu0 %v5773_v13  ;;  %v5857_v13 = vld [vmem:[#allocation10 + $0x708] ss:$52 sps:$4 sm:$0xff]  }
 0x369   :  { %4069 = vmatpush1.bf16.msra.mxu1 %v5776_v20  ;;  %3988 = vmatprep.subr.bf16.mxu0 %v5781_v21  ;;  %v5860_v20 = vld [vmem:[#allocation10 + $0x710] ss:$52 sps:$4 sm:$0xff]   ;;  %v5865_v21 = vld [vmem:[#allocation10 + $0x774] ss:$52 sps:$4 sm:$0xff]  }
 0x36a   :  { %4070 = vmatprep.subr.bf16.mxu1 %v5784_v63  ;;  %v5868_v63 = vld [vmem:[#allocation10 + $0x77c] ss:$52 sps:$4 sm:$0xff]  }
 0x36c   :  { %3989 = vmatpush1.bf16.msra.mxu0 %v5779_v22  ;;  %v5863_v22 = vld [vmem:[#allocation10 + $0x770] ss:$52 sps:$4 sm:$0xff]  }
 0x36d   :  { %4071 = vmatpush1.bf16.msra.mxu1 %v5782_v23  ;;  %3990 = vmatprep.subr.bf16.mxu0 %v5787_v24  ;;  %v5866_v23 = vld [vmem:[#allocation10 + $0x778] ss:$52 sps:$4 sm:$0xff]   ;;  %v5871_v24 = vld [vmem:[#allocation10 + $0x7dc] ss:$52 sps:$4 sm:$0xff]  }
 0x36e   :  { %4072 = vmatprep.subr.bf16.mxu1 %v5790_v4  ;;  %v5874_v4 = vld [vmem:[#allocation10 + $0x7e4] ss:$52 sps:$4 sm:$0xff]  }
 0x370   :  { %3991 = vmatpush1.bf16.msra.mxu0 %v5785_v25  ;;  %v5869_v25 = vld [vmem:[#allocation10 + $0x7d8] ss:$52 sps:$4 sm:$0xff]  }
 0x371   :  { %4073 = vmatpush1.bf16.msra.mxu1 %v5788_v26  ;;  %3992 = vmatprep.subr.bf16.mxu0 %v5793_v27  ;;  %v5872_v26 = vld [vmem:[#allocation10 + $0x7e0] ss:$52 sps:$4 sm:$0xff]   ;;  %v5877_v27 = vld [vmem:[#allocation10 + $0x844] ss:$52 sps:$4 sm:$0xff]  }
 0x372   :  { %4074 = vmatprep.subr.bf16.mxu1 %v5796_v14  ;;  %v5880_v14 = vld [vmem:[#allocation10 + $0x84c] ss:$52 sps:$4 sm:$0xff]  }
 0x374   :  { %3993 = vmatpush1.bf16.msra.mxu0 %v5791_v28  ;;  %v5875_v28 = vld [vmem:[#allocation10 + $0x840] ss:$52 sps:$4 sm:$0xff]  }
 0x375   :  { %4075 = vmatpush1.bf16.msra.mxu1 %v5794_v30  ;;  %3994 = vmatprep.subr.bf16.mxu0 %v5799_v32  ;;  %v1402_v30 = vld [vmem:[#allocation12] sm:$0xf]  ;;  %v5878_v32 = vld [vmem:[#allocation10 + $0x848] ss:$52 sps:$4 sm:$0xff]  }
 0x376   :  { %4076 = vmatprep.subr.bf16.mxu1 %v5802_v33  ;;  %v5883_v33 = vld [vmem:[#allocation10 + $0x8ac] ss:$52 sps:$4 sm:$0xff]  }
 0x378   :  { %3995 = vmatpush1.bf16.msra.mxu0 %v5797_v34  ;;  %v5886_v34 = vld [vmem:[#allocation10 + $0x8b4] ss:$52 sps:$4 sm:$0xff]  }
 0x379   :  { %4077 = vmatpush1.bf16.msra.mxu1 %v5800_v35  ;;  %3996 = vmatprep.subr.bf16.mxu0 %v5805_v36  ;;  %v1407_v35 = vrot.slane %v1402_v30, %v6298_v16  ;;  %v1415_v36 = vrot.slane %v1402_v30, %v6315_v18 }
 0x37a   :  { %4078 = vmatprep.subr.bf16.mxu1 %v5808_v29  ;;  %v1411_v29 = vrot.slane %v1402_v30, %v6301_v17 }
 0x37c   :  { %3997 = vmatpush1.bf16.msra.mxu0 %v5803_v38  ;;  %v1419_v38 = vrot.slane %v1402_v30, %v6306_v19  ;;  %v5935_v30 = vld [vmem:[#allocation10 + $0xc50] ss:$52 sps:$4 sm:$0xff]  }
 0x37d   :  { %4079 = vmatpush1.bf16.msra.mxu1 %v5806_v39  ;;  %3998 = vmatprep.subr.bf16.mxu0 %v5811_v40  ;;  %v5881_v39 = vld [vmem:[#allocation10 + $0x8a8] ss:$52 sps:$4 sm:$0xff]   ;;  %v5884_v40 = vld [vmem:[#allocation10 + $0x8b0] ss:$52 sps:$4 sm:$0xff]  }
 0x37e   :  { %4080 = vmatprep.subr.bf16.mxu1 %v5814_v41  ;;  %v5889_v41 = vld [vmem:[#allocation10 + $0x914] ss:$52 sps:$4 sm:$0xff]  }
 0x380   :  { %3999 = vmatpush1.bf16.msra.mxu0 %v5809_v42 }
 0x381   :  { %4081 = vmatpush1.bf16.msra.mxu1 %v5812_v43  ;;  %4000 = vmatprep.subr.bf16.mxu0 %v5817_v44  ;;  %v5892_v44 = vld [vmem:[#allocation10 + $0x91c] ss:$52 sps:$4 sm:$0xff]  }
 0x382   :  { %4082 = vmatprep.subr.bf16.mxu1 %v5820_v45 }
 0x384   :  { %4001 = vmatpush1.bf16.msra.mxu0 %v5815_v46 }
 0x385   :  { %4083 = vmatpush1.bf16.msra.mxu1 %v5818_v48  ;;  %4002 = vmatprep.subr.bf16.mxu0 %v5823_v49 }
 0x386   :  { %4084 = vmatprep.subr.bf16.mxu1 %v5826_v50 }
 0x388   :  { %4003 = vmatpush1.bf16.msra.mxu0 %v5821_v51 }
 0x389   :  { %4085 = vmatpush1.bf16.msra.mxu1 %v5824_v52  ;;  %4004 = vmatprep.subr.bf16.mxu0 %v5829_v53 }
 0x38a   :  { %4086 = vmatprep.subr.bf16.mxu1 %v5832_v54  ;;  %v5887_v54 = vld [vmem:[#allocation10 + $0x910] ss:$52 sps:$4 sm:$0xff]  }
 0x38c   :  { %4005 = vmatpush1.bf16.msra.mxu0 %v5827_v55 }
 0x38d   :  { %4087 = vmatpush1.bf16.msra.mxu1 %v5830_v56  ;;  %4006 = vmatprep.subr.bf16.mxu0 %v5835_v57  ;;  %v5890_v57 = vld [vmem:[#allocation10 + $0x918] ss:$52 sps:$4 sm:$0xff]  }
 0x38e   :  { %4088 = vmatprep.subr.bf16.mxu1 %v5838_v58  ;;  %v5895_v58 = vld [vmem:[#allocation10 + $0x97c] ss:$52 sps:$4 sm:$0xff]  }
 0x390   :  { %4007 = vmatpush1.bf16.msra.mxu0 %v5833_v59  ;;  %v5898_v59 = vld [vmem:[#allocation10 + $0x984] ss:$52 sps:$4 sm:$0xff]  }
 0x391   :  { %4089 = vmatpush1.bf16.msra.mxu1 %v5836_v60  ;;  %4008 = vmatprep.subr.bf16.mxu0 %v5841_v61  ;;  %v5893_v60 = vld [vmem:[#allocation10 + $0x978] ss:$52 sps:$4 sm:$0xff]   ;;  %v5896_v61 = vld [vmem:[#allocation10 + $0x980] ss:$52 sps:$4 sm:$0xff]  }
 0x392   :  { %4090 = vmatprep.subr.bf16.mxu1 %v5844_v62  ;;  %v5901_v62 = vld [vmem:[#allocation10 + $0x9e4] ss:$52 sps:$4 sm:$0xff]  }
 0x394   :  { %4009 = vmatpush1.bf16.msra.mxu0 %v5839_v0  ;;  %v5904_v0 = vld [vmem:[#allocation10 + $0x9ec] ss:$52 sps:$4 sm:$0xff]  }
 0x395   :  { %4091 = vmatpush1.bf16.msra.mxu1 %v5842_v1  ;;  %4010 = vmatprep.subr.bf16.mxu0 %v5847_v2  ;;  %v5899_v1 = vld [vmem:[#allocation10 + $0x9e0] ss:$52 sps:$4 sm:$0xff]   ;;  %v5902_v2 = vld [vmem:[#allocation10 + $0x9e8] ss:$52 sps:$4 sm:$0xff]  }
 0x396   :  { %4092 = vmatprep.subr.bf16.mxu1 %v5850_v3  ;;  %v5907_v3 = vld [vmem:[#allocation10 + $0xa4c] ss:$52 sps:$4 sm:$0xff]  }
 0x398   :  { %4011 = vmatpush1.bf16.msra.mxu0 %v5845_v5  ;;  %v5910_v5 = vld [vmem:[#allocation10 + $0xa54] ss:$52 sps:$4 sm:$0xff]  }
 0x399   :  { %4093 = vmatpush1.bf16.msra.mxu1 %v5848_v6  ;;  %4021 = vmatprep.subr.bf16.mxu0 %v5853_v7  ;;  %v5905_v6 = vld [vmem:[#allocation10 + $0xa48] ss:$52 sps:$4 sm:$0xff]   ;;  %v5908_v7 = vld [vmem:[#allocation10 + $0xa50] ss:$52 sps:$4 sm:$0xff]  }
 0x39a   :  { %4103 = vmatprep.subr.bf16.mxu1 %v5856_v8  ;;  %v5913_v8 = vld [vmem:[#allocation10 + $0xab4] ss:$52 sps:$4 sm:$0xff]  }
 0x39b   :  { %4013 = vmatmul.mubr.bf16.vlgmr.msra.gmra.mrb[16].mxu0 %v6332_v15 }
 0x39c   :  { %4095 = vmatmul.mubr.bf16.vlgmr.msra.gmra.mrb[16].mxu1 %v6332_v15  ;;  %4022 = vmatpush1.bf16.msra.mxu0 %v5851_v9  ;;  %v5916_v9 = vld [vmem:[#allocation10 + $0xabc] ss:$52 sps:$4 sm:$0xff]  }
 0x39d   :  { %4053 = vmatprep.mubr.bf16.mxu0 %v6336_v37  ;;  %4104 = vmatpush1.bf16.msra.mxu1 %v5854_v10  ;;  %v5911_v10 = vld [vmem:[#allocation10 + $0xab0] ss:$52 sps:$4 sm:$0xff]  }
 0x39e   :  { %4135 = vmatprep.mubr.bf16.mxu1 %v6336_v37  ;;  %4023 = vmatprep.subr.bf16.mxu0 %v5859_v11  ;;  %v5914_v11 = vld [vmem:[#allocation10 + $0xab8] ss:$52 sps:$4 sm:$0xff]  }
 0x39f   :  { %4105 = vmatprep.subr.bf16.mxu1 %v5862_v12  ;;  %v5919_v12 = vld [vmem:[#allocation10 + $0xb1c] ss:$52 sps:$4 sm:$0xff]  }
 0x3a0   :  { %4024 = vmatpush1.bf16.msra.mxu0 %v5857_v13  ;;  %v5922_v13 = vld [vmem:[#allocation10 + $0xb24] ss:$52 sps:$4 sm:$0xff]  }
 0x3a1   :  { %4106 = vmatpush1.bf16.msra.mxu1 %v5860_v20  ;;  %4025 = vmatprep.subr.bf16.mxu0 %v5865_v21  ;;  %v5917_v20 = vld [vmem:[#allocation10 + $0xb18] ss:$52 sps:$4 sm:$0xff]   ;;  %v5920_v21 = vld [vmem:[#allocation10 + $0xb20] ss:$52 sps:$4 sm:$0xff]  }
 0x3a2   :  { %4107 = vmatprep.subr.bf16.mxu1 %v5868_v63  ;;  %v5925_v63 = vld [vmem:[#allocation10 + $0xb84] ss:$52 sps:$4 sm:$0xff]  }
 0x3a4   :  { %4026 = vmatpush1.bf16.msra.mxu0 %v5863_v22  ;;  %v5928_v22 = vld [vmem:[#allocation10 + $0xb8c] ss:$52 sps:$4 sm:$0xff]  }
 0x3a5   :  { %4108 = vmatpush1.bf16.msra.mxu1 %v5866_v23  ;;  %4027 = vmatprep.subr.bf16.mxu0 %v5871_v24  ;;  %v5923_v23 = vld [vmem:[#allocation10 + $0xb80] ss:$52 sps:$4 sm:$0xff]   ;;  %v5926_v24 = vld [vmem:[#allocation10 + $0xb88] ss:$52 sps:$4 sm:$0xff]  }
 0x3a6   :  { %4109 = vmatprep.subr.bf16.mxu1 %v5874_v4  ;;  %v5931_v4 = vld [vmem:[#allocation10 + $0xbec] ss:$52 sps:$4 sm:$0xff]  }
 0x3a8   :  { %4028 = vmatpush1.bf16.msra.mxu0 %v5869_v25  ;;  %v5934_v25 = vld [vmem:[#allocation10 + $0xbf4] ss:$52 sps:$4 sm:$0xff]  }
 0x3a9   :  { %4110 = vmatpush1.bf16.msra.mxu1 %v5872_v26  ;;  %4029 = vmatprep.subr.bf16.mxu0 %v5877_v27  ;;  %v5929_v26 = vld [vmem:[#allocation10 + $0xbe8] ss:$52 sps:$4 sm:$0xff]   ;;  %v5932_v27 = vld [vmem:[#allocation10 + $0xbf0] ss:$52 sps:$4 sm:$0xff]  }
 0x3aa   :  { %4111 = vmatprep.subr.bf16.mxu1 %v5880_v14  ;;  %v5937_v14 = vld [vmem:[#allocation10 + $0xc54] ss:$52 sps:$4 sm:$0xff]  }
 0x3ac   :  { %4030 = vmatpush1.bf16.msra.mxu0 %v5875_v28  ;;  %v5940_v28 = vld [vmem:[#allocation10 + $0xc5c] ss:$52 sps:$4 sm:$0xff]  }
 0x3ad   :  { %4112 = vmatpush1.bf16.msra.mxu1 %v5878_v32  ;;  %4031 = vmatprep.subr.bf16.mxu0 %v5883_v33  ;;  %v5938_v32 = vld [vmem:[#allocation10 + $0xc58] ss:$52 sps:$4 sm:$0xff]   ;;  %v5943_v33 = vld [vmem:[#allocation10 + $0xcbc] ss:$52 sps:$4 sm:$0xff]  }
 0x3ae   :  { %v2139_v42 = vpop.f32.mrb[8].mxu0  ;;  %v2221_v43 = vpop.f32.mrb[8].mxu1  ;;  %4113 = vmatprep.subr.bf16.mxu1 %v5886_v34  ;;  %v5946_v34 = vld [vmem:[#allocation10 + $0xcc4] ss:$52 sps:$4 sm:$0xff]  }
 0x3af   :  { %v5111_v45 = vadd.f32 %v2139_v42, %v1407_v35  ;;  %v5113_v46 = vadd.f32 %v2221_v43, %v1415_v36  ;;  %v2141_v48 = vpop.f32.mrb[9].mxu0  ;;  %v2223_v49 = vpop.f32.mrb[9].mxu1  ;;  %v5941_v35 = vld [vmem:[#allocation10 + $0xcb8] ss:$52 sps:$4 sm:$0xff]   ;;  %v5944_v36 = vld [vmem:[#allocation10 + $0xcc0] ss:$52 sps:$4 sm:$0xff]  }
 0x3b0   :  { %v5112_v50 = vadd.f32 %v2141_v48, %v1411_v29  ;;  %v5114_v51 = vadd.f32 %v2223_v49, %v1419_v38  ;;  %v2143_v52 = vpop.f32.mrb[10].mxu0  ;;  %v2225_v53 = vpop.f32.mrb[10].mxu1  ;;  %4032 = vmatpush1.bf16.msra.mxu0 %v5881_v39  ;;  %v5947_v29 = vld [vmem:[#allocation10 + $0x370] ss:$52 sps:$4 sm:$0xff]   ;;  %v5952_v42 = vld [vmem:[#allocation10 + $0xa58] ss:$52 sps:$4 sm:$0xff]  }
 0x3b1   :  { %2228 = vst [vmem:[%s6427_s7] sm:$0xff] %v5111_v45  ;;  %2230 = vst [vmem:[%s6427_s7 + $0x10] sm:$0xff] %v5113_v46  ;;  %4114 = vmatpush1.bf16.msra.mxu1 %v5884_v40  ;;  %v2144_v55 = vpop.f32.mrb[11].mxu0  ;;  %v2226_v56 = vpop.f32.mrb[11].mxu1  ;;  %4033 = vmatprep.subr.bf16.mxu0 %v5889_v41  ;;  %v5948_v38 = vld [vmem:[#allocation10 + $0x9f0] ss:$52 sps:$4 sm:$0xff]  }
 0x3b2   :  { %2229 = vst [vmem:[%s6427_s7 + $0x8] sm:$0xff] %v5112_v50  ;;  %2231 = vst [vmem:[%s6427_s7 + $0x18] sm:$0xff] %v5114_v51  ;;  %4115 = vmatprep.subr.bf16.mxu1 %v5892_v44  ;;  %v5949_v39 = vld [vmem:[#allocation10 + $0x30] ss:$52 sps:$4 sm:$0xff]   ;;  %v5951_v41 = vld [vmem:[#allocation10 + $0x3d8] ss:$52 sps:$4 sm:$0xff]  }
 0x3b3   :  { %v5950_v40 = vld [vmem:[#allocation10 + $0x6b0] ss:$52 sps:$4 sm:$0xff]   ;;  %v5953_v43 = vld [vmem:[#allocation10 + $0x98] ss:$52 sps:$4 sm:$0xff]   ;;  %v5955_v45 = vld [vmem:[#allocation10 + $0x440] ss:$52 sps:$4 sm:$0xff]  }
 0x3b4   :  { %4034 = vmatpush1.bf16.msra.mxu0 %v5887_v54  ;;  %v5954_v44 = vld [vmem:[#allocation10 + $0x718] ss:$52 sps:$4 sm:$0xff]   ;;  %v5956_v46 = vld [vmem:[#allocation10 + $0xac0] ss:$52 sps:$4 sm:$0xff]   ;;  %v5959_v50 = vld [vmem:[#allocation10 + $0x4a8] ss:$52 sps:$4 sm:$0xff]  }
 0x3b5   :  { %4116 = vmatpush1.bf16.msra.mxu1 %v5890_v57  ;;  %4035 = vmatprep.subr.bf16.mxu0 %v5895_v58  ;;  %v5957_v48 = vld [vmem:[#allocation10 + $0x100] ss:$52 sps:$4 sm:$0xff]   ;;  %v5960_v51 = vld [vmem:[#allocation10 + $0xb28] ss:$52 sps:$4 sm:$0xff]   ;;  %v5963_v53 = vld [vmem:[#allocation10 + $0x510] ss:$52 sps:$4 sm:$0xff]  }
 0x3b6   :  { %4117 = vmatprep.subr.bf16.mxu1 %v5898_v59  ;;  %v5958_v49 = vld [vmem:[#allocation10 + $0x780] ss:$52 sps:$4 sm:$0xff]   ;;  %v5961_v52 = vld [vmem:[#allocation10 + $0x168] ss:$52 sps:$4 sm:$0xff]   ;;  %v5964_v54 = vld [vmem:[#allocation10 + $0xb90] ss:$52 sps:$4 sm:$0xff]  }
 0x3b7   :  { %v5966_v55 = vld [vmem:[#allocation10 + $0x850] ss:$52 sps:$4 sm:$0xff]   ;;  %v5967_v56 = vld [vmem:[#allocation10 + $0x578] ss:$52 sps:$4 sm:$0xff]  }
 0x3b8   :  { %4036 = vmatpush1.bf16.msra.mxu0 %v5893_v60  ;;  %v5968_v57 = vld [vmem:[#allocation10 + $0xbf8] ss:$52 sps:$4 sm:$0xff]   ;;  %v5971_v60 = vld [vmem:[#allocation10 + $0x5e0] ss:$52 sps:$4 sm:$0xff]  }
 0x3b9   :  { %4118 = vmatpush1.bf16.msra.mxu1 %v5896_v61  ;;  %4037 = vmatprep.subr.bf16.mxu0 %v5901_v62  ;;  %v5969_v58 = vld [vmem:[#allocation10 + $0x238] ss:$52 sps:$4 sm:$0xff]   ;;  %v5972_v61 = vld [vmem:[#allocation10 + $0xc60] ss:$52 sps:$4 sm:$0xff]  }
 0x3ba   :  { %4119 = vmatprep.subr.bf16.mxu1 %v5904_v0  ;;  %v5970_v59 = vld [vmem:[#allocation10 + $0x8b8] ss:$52 sps:$4 sm:$0xff]   ;;  %v5973_v62 = vld [vmem:[#allocation10 + $0x2a0] ss:$52 sps:$4 sm:$0xff]  }
 0x3bb   :  { %v5974_v0 = vld [vmem:[#allocation10 + $0x920] ss:$52 sps:$4 sm:$0xff]  }
 0x3bc   :  { %4038 = vmatpush1.bf16.msra.mxu0 %v5899_v1  ;;  %v5975_v1 = vld [vmem:[#allocation10 + $0x648] ss:$52 sps:$4 sm:$0xff]  }
 0x3bd   :  { %4120 = vmatpush1.bf16.msra.mxu1 %v5902_v2  ;;  %4039 = vmatprep.subr.bf16.mxu0 %v5907_v3  ;;  %v5976_v2 = vld [vmem:[#allocation10 + $0xcc8] ss:$52 sps:$4 sm:$0xff]  }
 0x3be   :  { %4121 = vmatprep.subr.bf16.mxu1 %v5910_v5  ;;  %v5977_v3 = vld [vmem:[#allocation10 + $0x308] ss:$52 sps:$4 sm:$0xff]  }
 0x3bf   :  { %v5978_v5 = vld [vmem:[#allocation10 + $0x988] ss:$52 sps:$4 sm:$0xff]  }
 0x3c0   :  { %4040 = vmatpush1.bf16.msra.mxu0 %v5905_v6  ;;  %v2360_v6 = vld [vmem:[#allocation12 + $0x4] sm:$0xf] }
 0x3c1   :  { %4122 = vmatpush1.bf16.msra.mxu1 %v5908_v7  ;;  %4041 = vmatprep.subr.bf16.mxu0 %v5913_v8  ;;  %v2365_v7 = vrot.slane %v2360_v6, %v6298_v16  ;;  %v2373_v8 = vrot.slane %v2360_v6, %v6315_v18 }
 0x3c2   :  { %4123 = vmatprep.subr.bf16.mxu1 %v5916_v9  ;;  %v2369_v9 = vrot.slane %v2360_v6, %v6301_v17 }
 0x3c4   :  { %4042 = vmatpush1.bf16.msra.mxu0 %v5911_v10  ;;  %v2377_v10 = vrot.slane %v2360_v6, %v6306_v19 }
 0x3c5   :  { %4124 = vmatpush1.bf16.msra.mxu1 %v5914_v11  ;;  %4043 = vmatprep.subr.bf16.mxu0 %v5919_v12 }
 0x3c6   :  { %4125 = vmatprep.subr.bf16.mxu1 %v5922_v13 }
 0x3c8   :  { %4044 = vmatpush1.bf16.msra.mxu0 %v5917_v20 }
 0x3c9   :  { %4126 = vmatpush1.bf16.msra.mxu1 %v5920_v21  ;;  %4045 = vmatprep.subr.bf16.mxu0 %v5925_v63 }
 0x3ca   :  { %4127 = vmatprep.subr.bf16.mxu1 %v5928_v22 }
 0x3cc   :  { %4046 = vmatpush1.bf16.msra.mxu0 %v5923_v23 }
 0x3cd   :  { %4128 = vmatpush1.bf16.msra.mxu1 %v5926_v24  ;;  %4047 = vmatprep.subr.bf16.mxu0 %v5931_v4 }
 0x3ce   :  { %4129 = vmatprep.subr.bf16.mxu1 %v5934_v25  ;;  %v3318_v25 = vld [vmem:[#allocation12 + $0x8] sm:$0xf] }
 0x3d0   :  { %4048 = vmatpush1.bf16.msra.mxu0 %v5929_v26  ;;  %v3323_v26 = vrot.slane %v3318_v25, %v6298_v16 }
 0x3d1   :  { %4130 = vmatpush1.bf16.msra.mxu1 %v5932_v27  ;;  %4049 = vmatprep.subr.bf16.mxu0 %v5937_v14  ;;  %v3331_v27 = vrot.slane %v3318_v25, %v6315_v18  ;;  %v3327_v14 = vrot.slane %v3318_v25, %v6301_v17 }
 0x3d2   :  { %4131 = vmatprep.subr.bf16.mxu1 %v5940_v28  ;;  %v3335_v28 = vrot.slane %v3318_v25, %v6306_v19 }
 0x3d4   :  { %4050 = vmatpush1.bf16.msra.mxu0 %v5935_v30 }
 0x3d5   :  { %4132 = vmatpush1.bf16.msra.mxu1 %v5938_v32  ;;  %4051 = vmatprep.subr.bf16.mxu0 %v5943_v33 }
 0x3d6   :  { %4133 = vmatprep.subr.bf16.mxu1 %v5946_v34 }
 0x3d8   :  { %4052 = vmatpush1.bf16.msra.mxu0 %v5941_v35 }
 0x3d9   :  { %4134 = vmatpush1.bf16.msra.mxu1 %v5944_v36  ;;  %5063 = vmatprep.subr.bf16.mxu0 %v5947_v29 }
 0x3da   :  { %5085 = vmatprep.subr.bf16.mxu1 %v5948_v38 }
 0x3db   :  { %4054 = vmatmul.mubr.bf16.vlgmr.msra.gmra.mrb[16].mxu0 %v6345_v47 }
 0x3dc   :  { %4136 = vmatmul.mubr.bf16.vlgmr.msra.gmra.mrb[16].mxu1 %v6345_v47  ;;  %5064 = vmatpush3.bf16.msra.mxu0 %v5949_v39 }
 0x3dd   :  { %4443 = vmatprep.mubr.bf16.mxu0 %v6330_v31  ;;  %5086 = vmatpush3.bf16.msra.mxu1 %v5950_v40  ;;  %v5962_v31 = vld [vmem:[#allocation10 + $0x7e8] ss:$52 sps:$4 sm:$0xff]  }
 0x3de   :  { %4483 = vmatprep.mubr.bf16.mxu1 %v6336_v37  ;;  %5065 = vmatprep.subr.bf16.mxu0 %v5951_v41  ;;  %v5965_v37 = vld [vmem:[#allocation10 + $0x1d0] ss:$52 sps:$4 sm:$0xff]   ;;  %v5030_v41 = vld [vmem:[#allocation12 + $0xc] ss:$0 sm:$0xff] }
 0x3df   :  { %5087 = vmatprep.subr.bf16.mxu1 %v5952_v42 }
 0x3e0   :  { %5066 = vmatpush3.bf16.msra.mxu0 %v5953_v43 }
 0x3e1   :  { %5088 = vmatpush3.bf16.msra.mxu1 %v5954_v44  ;;  %5067 = vmatprep.subr.bf16.mxu0 %v5955_v45 }
 0x3e2   :  { %5089 = vmatprep.subr.bf16.mxu1 %v5956_v46 }
 0x3e4   :  { %5068 = vmatpush3.bf16.msra.mxu0 %v5957_v48 }
 0x3e5   :  { %5090 = vmatpush3.bf16.msra.mxu1 %v5958_v49  ;;  %5069 = vmatprep.subr.bf16.mxu0 %v5959_v50 }
 0x3e6   :  { %5091 = vmatprep.subr.bf16.mxu1 %v5960_v51 }
 0x3e8   :  { %5070 = vmatpush3.bf16.msra.mxu0 %v5961_v52 }
 0x3e9   :  { %5092 = vmatpush3.bf16.msra.mxu1 %v5962_v31  ;;  %5071 = vmatprep.subr.bf16.mxu0 %v5963_v53 }
 0x3ea   :  { %5093 = vmatprep.subr.bf16.mxu1 %v5964_v54 }
 0x3ec   :  { %5072 = vmatpush3.bf16.msra.mxu0 %v5965_v37 }
 0x3ed   :  { %5094 = vmatpush3.bf16.msra.mxu1 %v5966_v55  ;;  %5073 = vmatprep.subr.bf16.mxu0 %v5967_v56 }
 0x3ee   :  { %5095 = vmatprep.subr.bf16.mxu1 %v5968_v57 }
 0x3f0   :  { %5074 = vmatpush3.bf16.msra.mxu0 %v5969_v58 }
 0x3f1   :  { %5096 = vmatpush3.bf16.msra.mxu1 %v5970_v59  ;;  %5075 = vmatprep.subr.bf16.mxu0 %v5971_v60 }
 0x3f2   :  { %5097 = vmatprep.subr.bf16.mxu1 %v5972_v61 }
 0x3f4   :  { %5076 = vmatpush3.bf16.msra.mxu0 %v5973_v62 }
 0x3f5   :  { %5098 = vmatpush3.bf16.msra.mxu1 %v5974_v0  ;;  %5077 = vmatprep.subr.bf16.mxu0 %v5975_v1 }
 0x3f6   :  { %5099 = vmatprep.subr.bf16.mxu1 %v5976_v2 }
 0x3f8   :  { %5078 = vmatpush3.bf16.msra.mxu0 %v5977_v3 }
 0x3f9   :  { %5100 = vmatpush3.bf16.msra.mxu1 %v5978_v5 }
 0x3fb   :  { %4444 = vmatmul.mubr.bf16.vlgmr.msra.gmra.mrb[20].mxu0 %v6332_v15 }
 0x3fc   :  { %4484 = vmatmul.mubr.bf16.vlgmr.msra.gmra.mrb[20].mxu1 %v6345_v47 }
 0x42e   :  { %v3097_v11 = vpop.f32.mrb[12].mxu0 }
 0x42f   :  { %v5115_v12 = vadd.f32 %v3097_v11, %v2365_v7  ;;  %v3179_v13 = vpop.f32.mrb[12].mxu1  ;;  %v3099_v20 = vpop.f32.mrb[13].mxu0 }
 0x430   :  { %v5117_v21 = vadd.f32 %v3179_v13, %v2373_v8  ;;  %v5116_v63 = vadd.f32 %v3099_v20, %v2369_v9  ;;  %v3181_v22 = vpop.f32.mrb[13].mxu1  ;;  %v3101_v23 = vpop.f32.mrb[14].mxu0 }
 0x431   :  { %3186 = vst [vmem:[%s6427_s7 + $0x20] sm:$0xff] %v5115_v12  ;;  %v5118_v15 = vadd.f32 %v3181_v22, %v2377_v10  ;;  %v3183_v47 = vpop.f32.mrb[14].mxu1  ;;  %v3102_v24 = vpop.f32.mrb[15].mxu0 }
 0x432   :  { %3188 = vst [vmem:[%s6427_s7 + $0x30] sm:$0xff] %v5117_v21  ;;  %3187 = vst [vmem:[%s6427_s7 + $0x28] sm:$0xff] %v5116_v63  ;;  %v3184_v4 = vpop.f32.mrb[15].mxu1 }
 0x433   :  { %3189 = vst [vmem:[%s6427_s7 + $0x38] sm:$0xff] %v5118_v15 }
 0x4ae   :  { %v4055_v30 = vpop.f32.mrb[16].mxu0 }
 0x4af   :  { %v5119_v32 = vadd.f32 %v4055_v30, %v3323_v26  ;;  %v4137_v33 = vpop.f32.mrb[16].mxu1  ;;  %v4057_v34 = vpop.f32.mrb[17].mxu0 }
 0x4b0   :  { %v5121_v35 = vadd.f32 %v4137_v33, %v3331_v27  ;;  %v5120_v36 = vadd.f32 %v4057_v34, %v3327_v14  ;;  %v4139_v29 = vpop.f32.mrb[17].mxu1  ;;  %v4059_v38 = vpop.f32.mrb[18].mxu0 }
 0x4b1   :  { %4144 = vst [vmem:[%s6427_s7 + $0x40] sm:$0xff] %v5119_v32  ;;  %v5122_v39 = vadd.f32 %v4139_v29, %v3335_v28  ;;  %v4141_v16 = vpop.f32.mrb[18].mxu1  ;;  %v4060_v40 = vpop.f32.mrb[19].mxu0 }
 0x4b2   :  { %4146 = vst [vmem:[%s6427_s7 + $0x50] sm:$0xff] %v5121_v35  ;;  %4145 = vst [vmem:[%s6427_s7 + $0x48] sm:$0xff] %v5120_v36  ;;  %v4142_v17 = vpop.f32.mrb[19].mxu1 }
 0x4b3   :  { %4147 = vst [vmem:[%s6427_s7 + $0x58] sm:$0xff] %v5122_v39 }
 0x4ce   :  { %v5079_v19 = vpop.f32.mrb[20].mxu0 }
 0x4cf   :  { %v5101_v18 = vpop.f32.mrb[20].mxu1  ;;  %v5080_v42 = vpop.f32.mrb[21].mxu0 }
 0x4d0   :  { %v5081_v43 = vadd.f32 %v5080_v42, %v5079_v19  ;;  %v5102_v44 = vpop.f32.mrb[21].mxu1  ;;  %v5082_v45 = vpop.f32.mrb[22].mxu0 }
 0x4d1   :  { %v5103_v46 = vadd.f32 %v5102_v44, %v5101_v18  ;;  %v5104_v48 = vpop.f32.mrb[22].mxu1  ;;  %v5083_v49 = vpop.f32.mrb[23].mxu0 }
 0x4d2   :  { %v4446_v50 = vadd.f32 %v5081_v43, %v5030_v41  ;;  %v5105_v51 = vpop.f32.mrb[23].mxu1 }
 0x4d4   :  { %v4486_v52 = vadd.f32 %v5103_v46, %v4446_v50 }
 0x4d6   :  { %4491 = vst [vmem:[%s6427_s7 + $0x60] sm:$0xff] %v4486_v52 }
 0x4d7   :  { %4496 = vsyncpa [#allocation3], 1 }
 0x4d8   :  { %4497 = vsyncpa [#allocation5], 1 }
 0x4d9   :  { %4498 = vsyncpa [#allocation8], 1 }
 0x4da   :  { %4499 = vsyncpa [#allocation11], 1 }

</bundles_post_ra>
